<compile_context>
chip_gen: v6e
topology: v6e:2x2x1
jax: 0.10.0
libtpu: 0.0.40
codegen_flags: <defaults>
</compile_context>

<pallas_src>
import functools
import math

import jax
import jax.numpy as jnp
from jax.experimental import pallas as pl
from jax.experimental.pallas import tpu as pltpu


# ----------------------------------------------------------------------------
# shared math helpers (pure jnp -> usable both inside the kernel and in the
# pure-JAX reference)
# ----------------------------------------------------------------------------
def _layer_norm(x, gamma, beta, eps=1e-5):
    mu = jnp.mean(x, axis=-1, keepdims=True)
    var = jnp.mean((x - mu) ** 2, axis=-1, keepdims=True)
    return (x - mu) * jax.lax.rsqrt(var + eps) * gamma + beta


def make_positional_encoding(seq_len, d_model):
    """Matches PositionalEncoding.pe[:seq_len, 0, :] (d_model even)."""
    position = jnp.arange(seq_len, dtype=jnp.float32)[:, None]
    div_term = jnp.exp(
        jnp.arange(0, d_model, 2, dtype=jnp.float32) * (-math.log(10000.0) / d_model)
    )
    pe = jnp.zeros((seq_len, d_model), dtype=jnp.float32)
    pe = pe.at[:, 0::2].set(jnp.sin(position * div_term))
    pe = pe.at[:, 1::2].set(jnp.cos(position * div_term))
    return pe


# ----------------------------------------------------------------------------
# fused forward kernel
# ----------------------------------------------------------------------------
def _transformer_kernel(
    x_ref, pe_ref,
    w_emb_ref, b_emb_ref,
    wq_ref, bq_ref, wk_ref, bk_ref, wv_ref, bv_ref, wo_ref, bo_ref,
    w1_ref, b1_ref, w2_ref, b2_ref,
    ln1g_ref, ln1b_ref, ln2g_ref, ln2b_ref,
    wres_ref, bres_ref, wfc1_ref, bfc1_ref, wfc2_ref, bfc2_ref,
    out_ref,
    *, num_layers, num_heads,
):
    # TODO(synk): dropout (PositionalEncoding / encoder layers) is omitted —
    # this implements the eval-mode forward (dropout == identity).
    x = x_ref[...].astype(jnp.float32)          # (B, S, I)
    B, S, I = x.shape
    pe = pe_ref[...].astype(jnp.float32)        # (S, H)
    H = pe.shape[-1]
    hd = H // num_heads
    scale = 1.0 / math.sqrt(hd)
    BS = B * S

    # ---- embedding + positional encoding ------------------------------------
    x2 = x.reshape(BS, I)
    h2 = jnp.dot(x2, w_emb_ref[...], preferred_element_type=jnp.float32) + b_emb_ref[...]
    h2 = (h2.reshape(B, S, H) + pe[None]).reshape(BS, H)

    # ---- post-LN transformer encoder layers ---------------------------------
    for l in range(num_layers):
        wq, wk, wv, wo = wq_ref[l], wk_ref[l], wv_ref[l], wo_ref[l]
        bq, bk, bv, bo = bq_ref[l], bk_ref[l], bv_ref[l], bo_ref[l]

        q2 = jnp.dot(h2, wq, preferred_element_type=jnp.float32) + bq
        k2 = jnp.dot(h2, wk, preferred_element_type=jnp.float32) + bk
        v2 = jnp.dot(h2, wv, preferred_element_type=jnp.float32) + bv
        q3 = q2.reshape(B, S, H)
        k3 = k2.reshape(B, S, H)
        v3 = v2.reshape(B, S, H)

        # multi-head scaled dot-product attention; heads concatenated
        # implicitly by splitting the out-projection rows (no jnp.concatenate).
        head_terms = []
        for hh in range(num_heads):
            lo = hh * hd
            qh = q3[:, :, lo:lo + hd]
            kh = k3[:, :, lo:lo + hd]
            vh = v3[:, :, lo:lo + hd]
            s_bqk = jnp.einsum('bqd,bkd->bqk', qh, kh,
                               preferred_element_type=jnp.float32) * scale
            m = jnp.max(s_bqk, axis=-1, keepdims=True)
            p = jnp.exp(s_bqk - m)
            p = p / jnp.sum(p, axis=-1, keepdims=True)
            oh = jnp.einsum('bqk,bkd->bqd', p, vh,
                            preferred_element_type=jnp.float32)
            head_terms.append(
                jnp.dot(oh.reshape(BS, hd), wo[lo:lo + hd, :],
                        preferred_element_type=jnp.float32))
        attn2 = sum(head_terms) + bo

        h2 = _layer_norm(h2 + attn2, ln1g_ref[l], ln1b_ref[l])

        f2 = jnp.maximum(
            jnp.dot(h2, w1_ref[l], preferred_element_type=jnp.float32) + b1_ref[l],
            0.0)
        f2 = jnp.dot(f2, w2_ref[l], preferred_element_type=jnp.float32) + b2_ref[l]
        h2 = _layer_norm(h2 + f2, ln2g_ref[l], ln2b_ref[l])

    # ---- head: last token + residual_fc branch + fc_layers ------------------
    h3 = h2.reshape(B, S, H)
    x_last = h3[:, S - 1, :]                               # (B, H)
    x_last_in = x[:, S - 1, :]                             # (B, I)
    x_res = (jnp.dot(x_last_in, wres_ref[...], preferred_element_type=jnp.float32)
             + bres_ref[...])                              # (B, H)

    # concat(x_last, x_res) @ W_fc1  ==  x_last @ W_fc1[:H] + x_res @ W_fc1[H:]
    wfc1 = wfc1_ref[...]                                   # (2H, H)
    z = (jnp.dot(x_last, wfc1[:H, :], preferred_element_type=jnp.float32)
         + jnp.dot(x_res, wfc1[H:, :], preferred_element_type=jnp.float32)
         + bfc1_ref[...])
    z = jnp.maximum(z, 0.0)
    out = jnp.dot(z, wfc2_ref[...], preferred_element_type=jnp.float32) + bfc2_ref[...]
    out_ref[...] = out.astype(out_ref.dtype)


def transformer_forward(x, params, *, num_heads):
    """Pallas equivalent of TransformerModel.forward (eval mode)."""
    B = x.shape[0]
    out_dim = params['w_fc2'].shape[1]
    num_layers = params['wq'].shape[0]

    args = (
        x, params['pe'],
        params['w_emb'], params['b_emb'],
        params['wq'], params['bq'], params['wk'], params['bk'],
        params['wv'], params['bv'], params['wo'], params['bo'],
        params['w1'], params['b1'], params['w2'], params['b2'],
        params['ln1_g'], params['ln1_b'], params['ln2_g'], params['ln2_b'],
        params['w_res'], params['b_res'],
        params['w_fc1'], params['b_fc1'], params['w_fc2'], params['b_fc2'],
    )
    kernel = functools.partial(
        _transformer_kernel, num_layers=num_layers, num_heads=num_heads)
    return pl.pallas_call(
        kernel,
        out_shape=jax.ShapeDtypeStruct((B, out_dim), jnp.float32),
        in_specs=[pl.BlockSpec(memory_space=pltpu.VMEM)] * len(args),
        out_specs=pl.BlockSpec(memory_space=pltpu.VMEM),
    )(*args)


# ----------------------------------------------------------------------------
# pure-JAX reference (mirrors the PyTorch semantics) for validation
# ----------------------------------------------------------------------------
def _reference_forward(x, params, *, num_heads):
    B, S, I = x.shape
    H = params['w_emb'].shape[1]
    L = params['wq'].shape[0]
    hd = H // num_heads
    scale = 1.0 / math.sqrt(hd)

    h = x @ params['w_emb'] + params['b_emb']
    h = h + params['pe'][None]
    for l in range(L):
        q = h @ params['wq'][l] + params['bq'][l]
        k = h @ params['wk'][l] + params['bk'][l]
        v = h @ params['wv'][l] + params['bv'][l]
        qh = q.reshape(B, S, num_heads, hd).transpose(0, 2, 1, 3)
        kh = k.reshape(B, S, num_heads, hd).transpose(0, 2, 1, 3)
        vh = v.reshape(B, S, num_heads, hd).transpose(0, 2, 1, 3)
        sc = jnp.einsum('bhqd,bhkd->bhqk', qh, kh) * scale
        p = jax.nn.softmax(sc, axis=-1)
        o = jnp.einsum('bhqk,bhkd->bhqd', p, vh).transpose(0, 2, 1, 3).reshape(B, S, H)
        attn = o @ params['wo'][l] + params['bo'][l]
        h = _layer_norm(h + attn, params['ln1_g'][l], params['ln1_b'][l])
        f = jax.nn.relu(h @ params['w1'][l] + params['b1'][l])
        f = f @ params['w2'][l] + params['b2'][l]
        h = _layer_norm(h + f, params['ln2_g'][l], params['ln2_b'][l])
    x_last = h[:, -1, :]
    x_res = x[:, -1, :] @ params['w_res'] + params['b_res']
    comb = jnp.concatenate([x_last, x_res], axis=-1)
    z = jax.nn.relu(comb @ params['w_fc1'] + params['b_fc1'])
    return z @ params['w_fc2'] + params['b_fc2']


# ----------------------------------------------------------------------------
# parameter construction (xavier-uniform weights, zero biases — like _init_weights)
# ----------------------------------------------------------------------------
def _xavier(key, shape):
    fan_in, fan_out = shape[-2], shape[-1]
    bound = math.sqrt(6.0 / (fan_in + fan_out))
    return jax.random.uniform(key, shape, jnp.float32, -bound, bound)


def init_params(key, *, input_dim, hidden_dim, output_dim, num_layers, seq_len):
    ks = iter(jax.random.split(key, 16))
    H, I, O, L = hidden_dim, input_dim, output_dim, num_layers
    F = hidden_dim  # dim_feedforward = hidden_dim in the spec
    z = lambda *s: jnp.zeros(s, jnp.float32)
    o = lambda *s: jnp.ones(s, jnp.float32)
    return {
        'pe': make_positional_encoding(seq_len, H),
        'w_emb': _xavier(next(ks), (I, H)), 'b_emb': z(1, H),
        'wq': _xavier(next(ks), (L, H, H)), 'bq': z(L, 1, H),
        'wk': _xavier(next(ks), (L, H, H)), 'bk': z(L, 1, H),
        'wv': _xavier(next(ks), (L, H, H)), 'bv': z(L, 1, H),
        'wo': _xavier(next(ks), (L, H, H)), 'bo': z(L, 1, H),
        'w1': _xavier(next(ks), (L, H, F)), 'b1': z(L, 1, F),
        'w2': _xavier(next(ks), (L, F, H)), 'b2': z(L, 1, H),
        'ln1_g': o(L, 1, H), 'ln1_b': z(L, 1, H),
        'ln2_g': o(L, 1, H), 'ln2_b': z(L, 1, H),
        'w_res': _xavier(next(ks), (I, H)), 'b_res': z(1, H),
        'w_fc1': _xavier(next(ks), (2 * H, H)), 'b_fc1': z(1, H),
        'w_fc2': _xavier(next(ks), (H, O)), 'b_fc2': z(1, O),
    }


if __name__ == "__main__":
    key = jax.random.PRNGKey(0)
    k_param, k_x = jax.random.split(key)

    # small shapes consistent with the module
    batch = 2
    seq_len = 8
    input_dim = 4
    hidden_dim = 32
    num_heads = 4
    num_layers = 2
    output_dim = 3

    params = init_params(
        k_param, input_dim=input_dim, hidden_dim=hidden_dim,
        output_dim=output_dim, num_layers=num_layers, seq_len=seq_len)
    x = jax.random.normal(k_x, (batch, seq_len, input_dim), dtype=jnp.float32)

    out = transformer_forward(x, params, num_heads=num_heads)
    out = jax.block_until_ready(out)

    ref = _reference_forward(x, params, num_heads=num_heads)
    assert out.shape == (batch, output_dim), out.shape
    assert jnp.allclose(out, ref, rtol=2e-4, atol=2e-4), (out, ref)

    print("KERNEL_OK")
</pallas_src>

<mosaic_0001>
module attributes {stable_mosaic.version = 11 : i64} {
  func.func @_transformer_kernel(%arg0: memref<2x8x4xf32, #tpu.memory_space<vmem>>, %arg1: memref<8x32xf32, #tpu.memory_space<vmem>>, %arg2: memref<4x32xf32, #tpu.memory_space<vmem>>, %arg3: memref<1x32xf32, #tpu.memory_space<vmem>>, %arg4: memref<2x32x32xf32, #tpu.memory_space<vmem>>, %arg5: memref<2x1x32xf32, #tpu.memory_space<vmem>>, %arg6: memref<2x32x32xf32, #tpu.memory_space<vmem>>, %arg7: memref<2x1x32xf32, #tpu.memory_space<vmem>>, %arg8: memref<2x32x32xf32, #tpu.memory_space<vmem>>, %arg9: memref<2x1x32xf32, #tpu.memory_space<vmem>>, %arg10: memref<2x32x32xf32, #tpu.memory_space<vmem>>, %arg11: memref<2x1x32xf32, #tpu.memory_space<vmem>>, %arg12: memref<2x32x32xf32, #tpu.memory_space<vmem>>, %arg13: memref<2x1x32xf32, #tpu.memory_space<vmem>>, %arg14: memref<2x32x32xf32, #tpu.memory_space<vmem>>, %arg15: memref<2x1x32xf32, #tpu.memory_space<vmem>>, %arg16: memref<2x1x32xf32, #tpu.memory_space<vmem>>, %arg17: memref<2x1x32xf32, #tpu.memory_space<vmem>>, %arg18: memref<2x1x32xf32, #tpu.memory_space<vmem>>, %arg19: memref<2x1x32xf32, #tpu.memory_space<vmem>>, %arg20: memref<4x32xf32, #tpu.memory_space<vmem>>, %arg21: memref<1x32xf32, #tpu.memory_space<vmem>>, %arg22: memref<64x32xf32, #tpu.memory_space<vmem>>, %arg23: memref<1x32xf32, #tpu.memory_space<vmem>>, %arg24: memref<32x3xf32, #tpu.memory_space<vmem>>, %arg25: memref<1x3xf32, #tpu.memory_space<vmem>>, %arg26: memref<2x3xf32, #tpu.memory_space<vmem>>) attributes {dimension_semantics = [], scalar_prefetch = 0 : i64, scratch_operands = 0 : i64, tpu.core_type = #tpu.core_type<tc>} {
    %c0 = arith.constant 0 : index
    %c0_0 = arith.constant 0 : index
    %c0_1 = arith.constant 0 : index
    %0 = vector.load %arg0[%c0, %c0_0, %c0_1] : memref<2x8x4xf32, #tpu.memory_space<vmem>>, vector<2x8x4xf32>
    %c0_2 = arith.constant 0 : index
    %c0_3 = arith.constant 0 : index
    %1 = vector.load %arg1[%c0_2, %c0_3] : memref<8x32xf32, #tpu.memory_space<vmem>>, vector<8x32xf32>
    %2 = vector.shape_cast %0 : vector<2x8x4xf32> to vector<16x4xf32>
    %c0_4 = arith.constant 0 : index
    %c0_5 = arith.constant 0 : index
    %3 = vector.load %arg2[%c0_4, %c0_5] : memref<4x32xf32, #tpu.memory_space<vmem>>, vector<4x32xf32>
    %cst = arith.constant dense<0.000000e+00> : vector<16x32xf32>
    %4 = tpu.matmul %2, %3, %cst {dimension_numbers = #tpu.dot_dimension_numbers<[1], [0], [0], [1], [0, 0, 1, 1], [], []>} : vector<16x4xf32>, vector<4x32xf32>, vector<16x32xf32> -> vector<16x32xf32>
    %c0_6 = arith.constant 0 : index
    %c0_7 = arith.constant 0 : index
    %5 = vector.load %arg3[%c0_6, %c0_7] : memref<1x32xf32, #tpu.memory_space<vmem>>, vector<1x32xf32>
    %6 = vector.broadcast %5 : vector<1x32xf32> to vector<16x32xf32>
    %7 = arith.addf %4, %6 : vector<16x32xf32>
    %8 = vector.shape_cast %7 : vector<16x32xf32> to vector<2x8x32xf32>
    %9 = vector.shape_cast %1 : vector<8x32xf32> to vector<1x8x32xf32>
    %10 = vector.broadcast %9 : vector<1x8x32xf32> to vector<2x8x32xf32>
    %11 = arith.addf %8, %10 : vector<2x8x32xf32>
    %12 = vector.shape_cast %11 : vector<2x8x32xf32> to vector<16x32xf32>
    %c0_8 = arith.constant 0 : index
    %c0_9 = arith.constant 0 : index
    %c0_10 = arith.constant 0 : index
    %13 = vector.load %arg4[%c0_8, %c0_9, %c0_10] : memref<2x32x32xf32, #tpu.memory_space<vmem>>, vector<1x32x32xf32>
    %14 = vector.shape_cast %13 : vector<1x32x32xf32> to vector<32x32xf32>
    %c0_11 = arith.constant 0 : index
    %c0_12 = arith.constant 0 : index
    %c0_13 = arith.constant 0 : index
    %15 = vector.load %arg6[%c0_11, %c0_12, %c0_13] : memref<2x32x32xf32, #tpu.memory_space<vmem>>, vector<1x32x32xf32>
    %16 = vector.shape_cast %15 : vector<1x32x32xf32> to vector<32x32xf32>
    %c0_14 = arith.constant 0 : index
    %c0_15 = arith.constant 0 : index
    %c0_16 = arith.constant 0 : index
    %17 = vector.load %arg8[%c0_14, %c0_15, %c0_16] : memref<2x32x32xf32, #tpu.memory_space<vmem>>, vector<1x32x32xf32>
    %18 = vector.shape_cast %17 : vector<1x32x32xf32> to vector<32x32xf32>
    %c0_17 = arith.constant 0 : index
    %c0_18 = arith.constant 0 : index
    %c0_19 = arith.constant 0 : index
    %19 = vector.load %arg10[%c0_17, %c0_18, %c0_19] : memref<2x32x32xf32, #tpu.memory_space<vmem>>, vector<1x32x32xf32>
    %20 = vector.shape_cast %19 : vector<1x32x32xf32> to vector<32x32xf32>
    %c0_20 = arith.constant 0 : index
    %c0_21 = arith.constant 0 : index
    %c0_22 = arith.constant 0 : index
    %21 = vector.load %arg5[%c0_20, %c0_21, %c0_22] : memref<2x1x32xf32, #tpu.memory_space<vmem>>, vector<1x1x32xf32>
    %22 = vector.shape_cast %21 : vector<1x1x32xf32> to vector<1x32xf32>
    %c0_23 = arith.constant 0 : index
    %c0_24 = arith.constant 0 : index
    %c0_25 = arith.constant 0 : index
    %23 = vector.load %arg7[%c0_23, %c0_24, %c0_25] : memref<2x1x32xf32, #tpu.memory_space<vmem>>, vector<1x1x32xf32>
    %24 = vector.shape_cast %23 : vector<1x1x32xf32> to vector<1x32xf32>
    %c0_26 = arith.constant 0 : index
    %c0_27 = arith.constant 0 : index
    %c0_28 = arith.constant 0 : index
    %25 = vector.load %arg9[%c0_26, %c0_27, %c0_28] : memref<2x1x32xf32, #tpu.memory_space<vmem>>, vector<1x1x32xf32>
    %26 = vector.shape_cast %25 : vector<1x1x32xf32> to vector<1x32xf32>
    %c0_29 = arith.constant 0 : index
    %c0_30 = arith.constant 0 : index
    %c0_31 = arith.constant 0 : index
    %27 = vector.load %arg11[%c0_29, %c0_30, %c0_31] : memref<2x1x32xf32, #tpu.memory_space<vmem>>, vector<1x1x32xf32>
    %28 = vector.shape_cast %27 : vector<1x1x32xf32> to vector<1x32xf32>
    %cst_32 = arith.constant dense<0.000000e+00> : vector<16x32xf32>
    %29 = tpu.matmul %12, %14, %cst_32 {dimension_numbers = #tpu.dot_dimension_numbers<[1], [0], [0], [1], [0, 0, 1, 1], [], []>} : vector<16x32xf32>, vector<32x32xf32>, vector<16x32xf32> -> vector<16x32xf32>
    %30 = vector.broadcast %22 : vector<1x32xf32> to vector<16x32xf32>
    %31 = arith.addf %29, %30 : vector<16x32xf32>
    %cst_33 = arith.constant dense<0.000000e+00> : vector<16x32xf32>
    %32 = tpu.matmul %12, %16, %cst_33 {dimension_numbers = #tpu.dot_dimension_numbers<[1], [0], [0], [1], [0, 0, 1, 1], [], []>} : vector<16x32xf32>, vector<32x32xf32>, vector<16x32xf32> -> vector<16x32xf32>
    %33 = vector.broadcast %24 : vector<1x32xf32> to vector<16x32xf32>
    %34 = arith.addf %32, %33 : vector<16x32xf32>
    %cst_34 = arith.constant dense<0.000000e+00> : vector<16x32xf32>
    %35 = tpu.matmul %12, %18, %cst_34 {dimension_numbers = #tpu.dot_dimension_numbers<[1], [0], [0], [1], [0, 0, 1, 1], [], []>} : vector<16x32xf32>, vector<32x32xf32>, vector<16x32xf32> -> vector<16x32xf32>
    %36 = vector.broadcast %26 : vector<1x32xf32> to vector<16x32xf32>
    %37 = arith.addf %35, %36 : vector<16x32xf32>
    %38 = vector.shape_cast %31 : vector<16x32xf32> to vector<2x8x32xf32>
    %39 = vector.shape_cast %34 : vector<16x32xf32> to vector<2x8x32xf32>
    %40 = vector.shape_cast %37 : vector<16x32xf32> to vector<2x8x32xf32>
    %41 = vector.extract_strided_slice %38 {offsets = [0, 0, 0], sizes = [2, 8, 8], strides = [1, 1, 1]} : vector<2x8x32xf32> to vector<2x8x8xf32>
    %42 = vector.extract_strided_slice %39 {offsets = [0, 0, 0], sizes = [2, 8, 8], strides = [1, 1, 1]} : vector<2x8x32xf32> to vector<2x8x8xf32>
    %43 = vector.extract_strided_slice %40 {offsets = [0, 0, 0], sizes = [2, 8, 8], strides = [1, 1, 1]} : vector<2x8x32xf32> to vector<2x8x8xf32>
    "tpu.trace_start"() <{level = 10 : i32, message = "bqd,bkd->bqk"}> : () -> ()
    %cst_35 = arith.constant dense<0.000000e+00> : vector<2x8x8xf32>
    %44 = tpu.matmul %41, %42, %cst_35 {dimension_numbers = #tpu.dot_dimension_numbers<[2], [2], [1], [1], [0, 0, 0, 1, 1, 1], [0], [0]>} : vector<2x8x8xf32>, vector<2x8x8xf32>, vector<2x8x8xf32> -> vector<2x8x8xf32>
    "tpu.trace_stop"() : () -> ()
    %cst_36 = arith.constant 0.353553385 : f32
    %45 = vector.broadcast %cst_36 : f32 to vector<2x8x8xf32>
    %46 = arith.mulf %44, %45 : vector<2x8x8xf32>
    %cst_37 = arith.constant dense<0xFF800000> : vector<2x8xf32>
    %47 = vector.multi_reduction <maximumf>, %46, %cst_37 [2] : vector<2x8x8xf32> to vector<2x8xf32>
    %48 = vector.shape_cast %47 : vector<2x8xf32> to vector<2x8x1xf32>
    %49 = vector.broadcast %48 : vector<2x8x1xf32> to vector<2x8x8xf32>
    %50 = arith.subf %46, %49 : vector<2x8x8xf32>
    %51 = math.exp %50 : vector<2x8x8xf32>
    %cst_38 = arith.constant dense<0.000000e+00> : vector<2x8xf32>
    %52 = vector.multi_reduction <add>, %51, %cst_38 [2] : vector<2x8x8xf32> to vector<2x8xf32>
    %53 = vector.shape_cast %52 : vector<2x8xf32> to vector<2x8x1xf32>
    %54 = vector.broadcast %53 : vector<2x8x1xf32> to vector<2x8x8xf32>
    %55 = arith.divf %51, %54 : vector<2x8x8xf32>
    "tpu.trace_start"() <{level = 10 : i32, message = "bqk,bkd->bqd"}> : () -> ()
    %cst_39 = arith.constant dense<0.000000e+00> : vector<2x8x8xf32>
    %56 = tpu.matmul %55, %43, %cst_39 {dimension_numbers = #tpu.dot_dimension_numbers<[2], [1], [1], [2], [0, 0, 0, 1, 1, 2], [0], [0]>} : vector<2x8x8xf32>, vector<2x8x8xf32>, vector<2x8x8xf32> -> vector<2x8x8xf32>
    "tpu.trace_stop"() : () -> ()
    %57 = vector.shape_cast %56 : vector<2x8x8xf32> to vector<16x8xf32>
    %58 = vector.extract_strided_slice %20 {offsets = [0, 0], sizes = [8, 32], strides = [1, 1]} : vector<32x32xf32> to vector<8x32xf32>
    %cst_40 = arith.constant dense<0.000000e+00> : vector<16x32xf32>
    %59 = tpu.matmul %57, %58, %cst_40 {dimension_numbers = #tpu.dot_dimension_numbers<[1], [0], [0], [1], [0, 0, 1, 1], [], []>} : vector<16x8xf32>, vector<8x32xf32>, vector<16x32xf32> -> vector<16x32xf32>
    %60 = vector.extract_strided_slice %38 {offsets = [0, 0, 8], sizes = [2, 8, 8], strides = [1, 1, 1]} : vector<2x8x32xf32> to vector<2x8x8xf32>
    %61 = vector.extract_strided_slice %39 {offsets = [0, 0, 8], sizes = [2, 8, 8], strides = [1, 1, 1]} : vector<2x8x32xf32> to vector<2x8x8xf32>
    %62 = vector.extract_strided_slice %40 {offsets = [0, 0, 8], sizes = [2, 8, 8], strides = [1, 1, 1]} : vector<2x8x32xf32> to vector<2x8x8xf32>
    "tpu.trace_start"() <{level = 10 : i32, message = "bqd,bkd->bqk"}> : () -> ()
    %cst_41 = arith.constant dense<0.000000e+00> : vector<2x8x8xf32>
    %63 = tpu.matmul %60, %61, %cst_41 {dimension_numbers = #tpu.dot_dimension_numbers<[2], [2], [1], [1], [0, 0, 0, 1, 1, 1], [0], [0]>} : vector<2x8x8xf32>, vector<2x8x8xf32>, vector<2x8x8xf32> -> vector<2x8x8xf32>
    "tpu.trace_stop"() : () -> ()
    %cst_42 = arith.constant 0.353553385 : f32
    %64 = vector.broadcast %cst_42 : f32 to vector<2x8x8xf32>
    %65 = arith.mulf %63, %64 : vector<2x8x8xf32>
    %cst_43 = arith.constant dense<0xFF800000> : vector<2x8xf32>
    %66 = vector.multi_reduction <maximumf>, %65, %cst_43 [2] : vector<2x8x8xf32> to vector<2x8xf32>
    %67 = vector.shape_cast %66 : vector<2x8xf32> to vector<2x8x1xf32>
    %68 = vector.broadcast %67 : vector<2x8x1xf32> to vector<2x8x8xf32>
    %69 = arith.subf %65, %68 : vector<2x8x8xf32>
    %70 = math.exp %69 : vector<2x8x8xf32>
    %cst_44 = arith.constant dense<0.000000e+00> : vector<2x8xf32>
    %71 = vector.multi_reduction <add>, %70, %cst_44 [2] : vector<2x8x8xf32> to vector<2x8xf32>
    %72 = vector.shape_cast %71 : vector<2x8xf32> to vector<2x8x1xf32>
    %73 = vector.broadcast %72 : vector<2x8x1xf32> to vector<2x8x8xf32>
    %74 = arith.divf %70, %73 : vector<2x8x8xf32>
    "tpu.trace_start"() <{level = 10 : i32, message = "bqk,bkd->bqd"}> : () -> ()
    %cst_45 = arith.constant dense<0.000000e+00> : vector<2x8x8xf32>
    %75 = tpu.matmul %74, %62, %cst_45 {dimension_numbers = #tpu.dot_dimension_numbers<[2], [1], [1], [2], [0, 0, 0, 1, 1, 2], [0], [0]>} : vector<2x8x8xf32>, vector<2x8x8xf32>, vector<2x8x8xf32> -> vector<2x8x8xf32>
    "tpu.trace_stop"() : () -> ()
    %76 = vector.shape_cast %75 : vector<2x8x8xf32> to vector<16x8xf32>
    %77 = vector.extract_strided_slice %20 {offsets = [8, 0], sizes = [8, 32], strides = [1, 1]} : vector<32x32xf32> to vector<8x32xf32>
    %cst_46 = arith.constant dense<0.000000e+00> : vector<16x32xf32>
    %78 = tpu.matmul %76, %77, %cst_46 {dimension_numbers = #tpu.dot_dimension_numbers<[1], [0], [0], [1], [0, 0, 1, 1], [], []>} : vector<16x8xf32>, vector<8x32xf32>, vector<16x32xf32> -> vector<16x32xf32>
    %79 = vector.extract_strided_slice %38 {offsets = [0, 0, 16], sizes = [2, 8, 8], strides = [1, 1, 1]} : vector<2x8x32xf32> to vector<2x8x8xf32>
    %80 = vector.extract_strided_slice %39 {offsets = [0, 0, 16], sizes = [2, 8, 8], strides = [1, 1, 1]} : vector<2x8x32xf32> to vector<2x8x8xf32>
    %81 = vector.extract_strided_slice %40 {offsets = [0, 0, 16], sizes = [2, 8, 8], strides = [1, 1, 1]} : vector<2x8x32xf32> to vector<2x8x8xf32>
    "tpu.trace_start"() <{level = 10 : i32, message = "bqd,bkd->bqk"}> : () -> ()
    %cst_47 = arith.constant dense<0.000000e+00> : vector<2x8x8xf32>
    %82 = tpu.matmul %79, %80, %cst_47 {dimension_numbers = #tpu.dot_dimension_numbers<[2], [2], [1], [1], [0, 0, 0, 1, 1, 1], [0], [0]>} : vector<2x8x8xf32>, vector<2x8x8xf32>, vector<2x8x8xf32> -> vector<2x8x8xf32>
    "tpu.trace_stop"() : () -> ()
    %cst_48 = arith.constant 0.353553385 : f32
    %83 = vector.broadcast %cst_48 : f32 to vector<2x8x8xf32>
    %84 = arith.mulf %82, %83 : vector<2x8x8xf32>
    %cst_49 = arith.constant dense<0xFF800000> : vector<2x8xf32>
    %85 = vector.multi_reduction <maximumf>, %84, %cst_49 [2] : vector<2x8x8xf32> to vector<2x8xf32>
    %86 = vector.shape_cast %85 : vector<2x8xf32> to vector<2x8x1xf32>
    %87 = vector.broadcast %86 : vector<2x8x1xf32> to vector<2x8x8xf32>
    %88 = arith.subf %84, %87 : vector<2x8x8xf32>
    %89 = math.exp %88 : vector<2x8x8xf32>
    %cst_50 = arith.constant dense<0.000000e+00> : vector<2x8xf32>
    %90 = vector.multi_reduction <add>, %89, %cst_50 [2] : vector<2x8x8xf32> to vector<2x8xf32>
    %91 = vector.shape_cast %90 : vector<2x8xf32> to vector<2x8x1xf32>
    %92 = vector.broadcast %91 : vector<2x8x1xf32> to vector<2x8x8xf32>
    %93 = arith.divf %89, %92 : vector<2x8x8xf32>
    "tpu.trace_start"() <{level = 10 : i32, message = "bqk,bkd->bqd"}> : () -> ()
    %cst_51 = arith.constant dense<0.000000e+00> : vector<2x8x8xf32>
    %94 = tpu.matmul %93, %81, %cst_51 {dimension_numbers = #tpu.dot_dimension_numbers<[2], [1], [1], [2], [0, 0, 0, 1, 1, 2], [0], [0]>} : vector<2x8x8xf32>, vector<2x8x8xf32>, vector<2x8x8xf32> -> vector<2x8x8xf32>
    "tpu.trace_stop"() : () -> ()
    %95 = vector.shape_cast %94 : vector<2x8x8xf32> to vector<16x8xf32>
    %96 = vector.extract_strided_slice %20 {offsets = [16, 0], sizes = [8, 32], strides = [1, 1]} : vector<32x32xf32> to vector<8x32xf32>
    %cst_52 = arith.constant dense<0.000000e+00> : vector<16x32xf32>
    %97 = tpu.matmul %95, %96, %cst_52 {dimension_numbers = #tpu.dot_dimension_numbers<[1], [0], [0], [1], [0, 0, 1, 1], [], []>} : vector<16x8xf32>, vector<8x32xf32>, vector<16x32xf32> -> vector<16x32xf32>
    %98 = vector.extract_strided_slice %38 {offsets = [0, 0, 24], sizes = [2, 8, 8], strides = [1, 1, 1]} : vector<2x8x32xf32> to vector<2x8x8xf32>
    %99 = vector.extract_strided_slice %39 {offsets = [0, 0, 24], sizes = [2, 8, 8], strides = [1, 1, 1]} : vector<2x8x32xf32> to vector<2x8x8xf32>
    %100 = vector.extract_strided_slice %40 {offsets = [0, 0, 24], sizes = [2, 8, 8], strides = [1, 1, 1]} : vector<2x8x32xf32> to vector<2x8x8xf32>
    "tpu.trace_start"() <{level = 10 : i32, message = "bqd,bkd->bqk"}> : () -> ()
    %cst_53 = arith.constant dense<0.000000e+00> : vector<2x8x8xf32>
    %101 = tpu.matmul %98, %99, %cst_53 {dimension_numbers = #tpu.dot_dimension_numbers<[2], [2], [1], [1], [0, 0, 0, 1, 1, 1], [0], [0]>} : vector<2x8x8xf32>, vector<2x8x8xf32>, vector<2x8x8xf32> -> vector<2x8x8xf32>
    "tpu.trace_stop"() : () -> ()
    %cst_54 = arith.constant 0.353553385 : f32
    %102 = vector.broadcast %cst_54 : f32 to vector<2x8x8xf32>
    %103 = arith.mulf %101, %102 : vector<2x8x8xf32>
    %cst_55 = arith.constant dense<0xFF800000> : vector<2x8xf32>
    %104 = vector.multi_reduction <maximumf>, %103, %cst_55 [2] : vector<2x8x8xf32> to vector<2x8xf32>
    %105 = vector.shape_cast %104 : vector<2x8xf32> to vector<2x8x1xf32>
    %106 = vector.broadcast %105 : vector<2x8x1xf32> to vector<2x8x8xf32>
    %107 = arith.subf %103, %106 : vector<2x8x8xf32>
    %108 = math.exp %107 : vector<2x8x8xf32>
    %cst_56 = arith.constant dense<0.000000e+00> : vector<2x8xf32>
    %109 = vector.multi_reduction <add>, %108, %cst_56 [2] : vector<2x8x8xf32> to vector<2x8xf32>
    %110 = vector.shape_cast %109 : vector<2x8xf32> to vector<2x8x1xf32>
    %111 = vector.broadcast %110 : vector<2x8x1xf32> to vector<2x8x8xf32>
    %112 = arith.divf %108, %111 : vector<2x8x8xf32>
    "tpu.trace_start"() <{level = 10 : i32, message = "bqk,bkd->bqd"}> : () -> ()
    %cst_57 = arith.constant dense<0.000000e+00> : vector<2x8x8xf32>
    %113 = tpu.matmul %112, %100, %cst_57 {dimension_numbers = #tpu.dot_dimension_numbers<[2], [1], [1], [2], [0, 0, 0, 1, 1, 2], [0], [0]>} : vector<2x8x8xf32>, vector<2x8x8xf32>, vector<2x8x8xf32> -> vector<2x8x8xf32>
    "tpu.trace_stop"() : () -> ()
    %114 = vector.shape_cast %113 : vector<2x8x8xf32> to vector<16x8xf32>
    %115 = vector.extract_strided_slice %20 {offsets = [24, 0], sizes = [8, 32], strides = [1, 1]} : vector<32x32xf32> to vector<8x32xf32>
    %cst_58 = arith.constant dense<0.000000e+00> : vector<16x32xf32>
    %116 = tpu.matmul %114, %115, %cst_58 {dimension_numbers = #tpu.dot_dimension_numbers<[1], [0], [0], [1], [0, 0, 1, 1], [], []>} : vector<16x8xf32>, vector<8x32xf32>, vector<16x32xf32> -> vector<16x32xf32>
    %cst_59 = arith.constant 0.000000e+00 : f32
    %117 = vector.broadcast %cst_59 : f32 to vector<16x32xf32>
    %118 = arith.addf %117, %59 : vector<16x32xf32>
    %119 = arith.addf %118, %78 : vector<16x32xf32>
    %120 = arith.addf %119, %97 : vector<16x32xf32>
    %121 = arith.addf %120, %116 : vector<16x32xf32>
    %122 = vector.broadcast %28 : vector<1x32xf32> to vector<16x32xf32>
    %123 = arith.addf %121, %122 : vector<16x32xf32>
    %124 = arith.addf %12, %123 : vector<16x32xf32>
    %c0_60 = arith.constant 0 : index
    %c0_61 = arith.constant 0 : index
    %c0_62 = arith.constant 0 : index
    %125 = vector.load %arg16[%c0_60, %c0_61, %c0_62] : memref<2x1x32xf32, #tpu.memory_space<vmem>>, vector<1x1x32xf32>
    %126 = vector.shape_cast %125 : vector<1x1x32xf32> to vector<1x32xf32>
    %c0_63 = arith.constant 0 : index
    %c0_64 = arith.constant 0 : index
    %c0_65 = arith.constant 0 : index
    %127 = vector.load %arg17[%c0_63, %c0_64, %c0_65] : memref<2x1x32xf32, #tpu.memory_space<vmem>>, vector<1x1x32xf32>
    %128 = vector.shape_cast %127 : vector<1x1x32xf32> to vector<1x32xf32>
    %cst_66 = arith.constant dense<0.000000e+00> : vector<16xf32>
    %129 = vector.multi_reduction <add>, %124, %cst_66 [1] : vector<16x32xf32> to vector<16xf32>
    %130 = vector.shape_cast %129 : vector<16xf32> to vector<16x1xf32>
    %cst_67 = arith.constant 3.200000e+01 : f32
    %131 = vector.broadcast %cst_67 : f32 to vector<16x1xf32>
    %132 = arith.divf %130, %131 : vector<16x1xf32>
    %133 = vector.broadcast %132 : vector<16x1xf32> to vector<16x32xf32>
    %134 = arith.subf %124, %133 : vector<16x32xf32>
    %135 = arith.mulf %134, %134 : vector<16x32xf32>
    %cst_68 = arith.constant dense<0.000000e+00> : vector<16xf32>
    %136 = vector.multi_reduction <add>, %135, %cst_68 [1] : vector<16x32xf32> to vector<16xf32>
    %137 = vector.shape_cast %136 : vector<16xf32> to vector<16x1xf32>
    %cst_69 = arith.constant 3.200000e+01 : f32
    %138 = vector.broadcast %cst_69 : f32 to vector<16x1xf32>
    %139 = arith.divf %137, %138 : vector<16x1xf32>
    %140 = vector.broadcast %132 : vector<16x1xf32> to vector<16x32xf32>
    %141 = arith.subf %124, %140 : vector<16x32xf32>
    %cst_70 = arith.constant 9.99999974E-6 : f32
    %142 = vector.broadcast %cst_70 : f32 to vector<16x1xf32>
    %143 = arith.addf %139, %142 : vector<16x1xf32>
    %144 = math.rsqrt %143 : vector<16x1xf32>
    %145 = vector.broadcast %144 : vector<16x1xf32> to vector<16x32xf32>
    %146 = arith.mulf %141, %145 : vector<16x32xf32>
    %147 = vector.broadcast %126 : vector<1x32xf32> to vector<16x32xf32>
    %148 = arith.mulf %146, %147 : vector<16x32xf32>
    %149 = vector.broadcast %128 : vector<1x32xf32> to vector<16x32xf32>
    %150 = arith.addf %148, %149 : vector<16x32xf32>
    %c0_71 = arith.constant 0 : index
    %c0_72 = arith.constant 0 : index
    %c0_73 = arith.constant 0 : index
    %151 = vector.load %arg12[%c0_71, %c0_72, %c0_73] : memref<2x32x32xf32, #tpu.memory_space<vmem>>, vector<1x32x32xf32>
    %152 = vector.shape_cast %151 : vector<1x32x32xf32> to vector<32x32xf32>
    %cst_74 = arith.constant dense<0.000000e+00> : vector<16x32xf32>
    %153 = tpu.matmul %150, %152, %cst_74 {dimension_numbers = #tpu.dot_dimension_numbers<[1], [0], [0], [1], [0, 0, 1, 1], [], []>} : vector<16x32xf32>, vector<32x32xf32>, vector<16x32xf32> -> vector<16x32xf32>
    %c0_75 = arith.constant 0 : index
    %c0_76 = arith.constant 0 : index
    %c0_77 = arith.constant 0 : index
    %154 = vector.load %arg13[%c0_75, %c0_76, %c0_77] : memref<2x1x32xf32, #tpu.memory_space<vmem>>, vector<1x1x32xf32>
    %155 = vector.shape_cast %154 : vector<1x1x32xf32> to vector<1x32xf32>
    %156 = vector.broadcast %155 : vector<1x32xf32> to vector<16x32xf32>
    %157 = arith.addf %153, %156 : vector<16x32xf32>
    %cst_78 = arith.constant 0.000000e+00 : f32
    %158 = vector.broadcast %cst_78 : f32 to vector<16x32xf32>
    %159 = arith.maximumf %157, %158 : vector<16x32xf32>
    %c0_79 = arith.constant 0 : index
    %c0_80 = arith.constant 0 : index
    %c0_81 = arith.constant 0 : index
    %160 = vector.load %arg14[%c0_79, %c0_80, %c0_81] : memref<2x32x32xf32, #tpu.memory_space<vmem>>, vector<1x32x32xf32>
    %161 = vector.shape_cast %160 : vector<1x32x32xf32> to vector<32x32xf32>
    %cst_82 = arith.constant dense<0.000000e+00> : vector<16x32xf32>
    %162 = tpu.matmul %159, %161, %cst_82 {dimension_numbers = #tpu.dot_dimension_numbers<[1], [0], [0], [1], [0, 0, 1, 1], [], []>} : vector<16x32xf32>, vector<32x32xf32>, vector<16x32xf32> -> vector<16x32xf32>
    %c0_83 = arith.constant 0 : index
    %c0_84 = arith.constant 0 : index
    %c0_85 = arith.constant 0 : index
    %163 = vector.load %arg15[%c0_83, %c0_84, %c0_85] : memref<2x1x32xf32, #tpu.memory_space<vmem>>, vector<1x1x32xf32>
    %164 = vector.shape_cast %163 : vector<1x1x32xf32> to vector<1x32xf32>
    %165 = vector.broadcast %164 : vector<1x32xf32> to vector<16x32xf32>
    %166 = arith.addf %162, %165 : vector<16x32xf32>
    %167 = arith.addf %150, %166 : vector<16x32xf32>
    %c0_86 = arith.constant 0 : index
    %c0_87 = arith.constant 0 : index
    %c0_88 = arith.constant 0 : index
    %168 = vector.load %arg18[%c0_86, %c0_87, %c0_88] : memref<2x1x32xf32, #tpu.memory_space<vmem>>, vector<1x1x32xf32>
    %169 = vector.shape_cast %168 : vector<1x1x32xf32> to vector<1x32xf32>
    %c0_89 = arith.constant 0 : index
    %c0_90 = arith.constant 0 : index
    %c0_91 = arith.constant 0 : index
    %170 = vector.load %arg19[%c0_89, %c0_90, %c0_91] : memref<2x1x32xf32, #tpu.memory_space<vmem>>, vector<1x1x32xf32>
    %171 = vector.shape_cast %170 : vector<1x1x32xf32> to vector<1x32xf32>
    %cst_92 = arith.constant dense<0.000000e+00> : vector<16xf32>
    %172 = vector.multi_reduction <add>, %167, %cst_92 [1] : vector<16x32xf32> to vector<16xf32>
    %173 = vector.shape_cast %172 : vector<16xf32> to vector<16x1xf32>
    %cst_93 = arith.constant 3.200000e+01 : f32
    %174 = vector.broadcast %cst_93 : f32 to vector<16x1xf32>
    %175 = arith.divf %173, %174 : vector<16x1xf32>
    %176 = vector.broadcast %175 : vector<16x1xf32> to vector<16x32xf32>
    %177 = arith.subf %167, %176 : vector<16x32xf32>
    %178 = arith.mulf %177, %177 : vector<16x32xf32>
    %cst_94 = arith.constant dense<0.000000e+00> : vector<16xf32>
    %179 = vector.multi_reduction <add>, %178, %cst_94 [1] : vector<16x32xf32> to vector<16xf32>
    %180 = vector.shape_cast %179 : vector<16xf32> to vector<16x1xf32>
    %cst_95 = arith.constant 3.200000e+01 : f32
    %181 = vector.broadcast %cst_95 : f32 to vector<16x1xf32>
    %182 = arith.divf %180, %181 : vector<16x1xf32>
    %183 = vector.broadcast %175 : vector<16x1xf32> to vector<16x32xf32>
    %184 = arith.subf %167, %183 : vector<16x32xf32>
    %cst_96 = arith.constant 9.99999974E-6 : f32
    %185 = vector.broadcast %cst_96 : f32 to vector<16x1xf32>
    %186 = arith.addf %182, %185 : vector<16x1xf32>
    %187 = math.rsqrt %186 : vector<16x1xf32>
    %188 = vector.broadcast %187 : vector<16x1xf32> to vector<16x32xf32>
    %189 = arith.mulf %184, %188 : vector<16x32xf32>
    %190 = vector.broadcast %169 : vector<1x32xf32> to vector<16x32xf32>
    %191 = arith.mulf %189, %190 : vector<16x32xf32>
    %192 = vector.broadcast %171 : vector<1x32xf32> to vector<16x32xf32>
    %193 = arith.addf %191, %192 : vector<16x32xf32>
    %c1 = arith.constant 1 : index
    %c0_97 = arith.constant 0 : index
    %c0_98 = arith.constant 0 : index
    %194 = vector.load %arg4[%c1, %c0_97, %c0_98] : memref<2x32x32xf32, #tpu.memory_space<vmem>>, vector<1x32x32xf32>
    %195 = vector.shape_cast %194 : vector<1x32x32xf32> to vector<32x32xf32>
    %c1_99 = arith.constant 1 : index
    %c0_100 = arith.constant 0 : index
    %c0_101 = arith.constant 0 : index
    %196 = vector.load %arg6[%c1_99, %c0_100, %c0_101] : memref<2x32x32xf32, #tpu.memory_space<vmem>>, vector<1x32x32xf32>
    %197 = vector.shape_cast %196 : vector<1x32x32xf32> to vector<32x32xf32>
    %c1_102 = arith.constant 1 : index
    %c0_103 = arith.constant 0 : index
    %c0_104 = arith.constant 0 : index
    %198 = vector.load %arg8[%c1_102, %c0_103, %c0_104] : memref<2x32x32xf32, #tpu.memory_space<vmem>>, vector<1x32x32xf32>
    %199 = vector.shape_cast %198 : vector<1x32x32xf32> to vector<32x32xf32>
    %c1_105 = arith.constant 1 : index
    %c0_106 = arith.constant 0 : index
    %c0_107 = arith.constant 0 : index
    %200 = vector.load %arg10[%c1_105, %c0_106, %c0_107] : memref<2x32x32xf32, #tpu.memory_space<vmem>>, vector<1x32x32xf32>
    %201 = vector.shape_cast %200 : vector<1x32x32xf32> to vector<32x32xf32>
    %c1_108 = arith.constant 1 : index
    %c0_109 = arith.constant 0 : index
    %c0_110 = arith.constant 0 : index
    %202 = vector.load %arg5[%c1_108, %c0_109, %c0_110] : memref<2x1x32xf32, #tpu.memory_space<vmem>>, vector<1x1x32xf32>
    %203 = vector.shape_cast %202 : vector<1x1x32xf32> to vector<1x32xf32>
    %c1_111 = arith.constant 1 : index
    %c0_112 = arith.constant 0 : index
    %c0_113 = arith.constant 0 : index
    %204 = vector.load %arg7[%c1_111, %c0_112, %c0_113] : memref<2x1x32xf32, #tpu.memory_space<vmem>>, vector<1x1x32xf32>
    %205 = vector.shape_cast %204 : vector<1x1x32xf32> to vector<1x32xf32>
    %c1_114 = arith.constant 1 : index
    %c0_115 = arith.constant 0 : index
    %c0_116 = arith.constant 0 : index
    %206 = vector.load %arg9[%c1_114, %c0_115, %c0_116] : memref<2x1x32xf32, #tpu.memory_space<vmem>>, vector<1x1x32xf32>
    %207 = vector.shape_cast %206 : vector<1x1x32xf32> to vector<1x32xf32>
    %c1_117 = arith.constant 1 : index
    %c0_118 = arith.constant 0 : index
    %c0_119 = arith.constant 0 : index
    %208 = vector.load %arg11[%c1_117, %c0_118, %c0_119] : memref<2x1x32xf32, #tpu.memory_space<vmem>>, vector<1x1x32xf32>
    %209 = vector.shape_cast %208 : vector<1x1x32xf32> to vector<1x32xf32>
    %cst_120 = arith.constant dense<0.000000e+00> : vector<16x32xf32>
    %210 = tpu.matmul %193, %195, %cst_120 {dimension_numbers = #tpu.dot_dimension_numbers<[1], [0], [0], [1], [0, 0, 1, 1], [], []>} : vector<16x32xf32>, vector<32x32xf32>, vector<16x32xf32> -> vector<16x32xf32>
    %211 = vector.broadcast %203 : vector<1x32xf32> to vector<16x32xf32>
    %212 = arith.addf %210, %211 : vector<16x32xf32>
    %cst_121 = arith.constant dense<0.000000e+00> : vector<16x32xf32>
    %213 = tpu.matmul %193, %197, %cst_121 {dimension_numbers = #tpu.dot_dimension_numbers<[1], [0], [0], [1], [0, 0, 1, 1], [], []>} : vector<16x32xf32>, vector<32x32xf32>, vector<16x32xf32> -> vector<16x32xf32>
    %214 = vector.broadcast %205 : vector<1x32xf32> to vector<16x32xf32>
    %215 = arith.addf %213, %214 : vector<16x32xf32>
    %cst_122 = arith.constant dense<0.000000e+00> : vector<16x32xf32>
    %216 = tpu.matmul %193, %199, %cst_122 {dimension_numbers = #tpu.dot_dimension_numbers<[1], [0], [0], [1], [0, 0, 1, 1], [], []>} : vector<16x32xf32>, vector<32x32xf32>, vector<16x32xf32> -> vector<16x32xf32>
    %217 = vector.broadcast %207 : vector<1x32xf32> to vector<16x32xf32>
    %218 = arith.addf %216, %217 : vector<16x32xf32>
    %219 = vector.shape_cast %212 : vector<16x32xf32> to vector<2x8x32xf32>
    %220 = vector.shape_cast %215 : vector<16x32xf32> to vector<2x8x32xf32>
    %221 = vector.shape_cast %218 : vector<16x32xf32> to vector<2x8x32xf32>
    %222 = vector.extract_strided_slice %219 {offsets = [0, 0, 0], sizes = [2, 8, 8], strides = [1, 1, 1]} : vector<2x8x32xf32> to vector<2x8x8xf32>
    %223 = vector.extract_strided_slice %220 {offsets = [0, 0, 0], sizes = [2, 8, 8], strides = [1, 1, 1]} : vector<2x8x32xf32> to vector<2x8x8xf32>
    %224 = vector.extract_strided_slice %221 {offsets = [0, 0, 0], sizes = [2, 8, 8], strides = [1, 1, 1]} : vector<2x8x32xf32> to vector<2x8x8xf32>
    "tpu.trace_start"() <{level = 10 : i32, message = "bqd,bkd->bqk"}> : () -> ()
    %cst_123 = arith.constant dense<0.000000e+00> : vector<2x8x8xf32>
    %225 = tpu.matmul %222, %223, %cst_123 {dimension_numbers = #tpu.dot_dimension_numbers<[2], [2], [1], [1], [0, 0, 0, 1, 1, 1], [0], [0]>} : vector<2x8x8xf32>, vector<2x8x8xf32>, vector<2x8x8xf32> -> vector<2x8x8xf32>
    "tpu.trace_stop"() : () -> ()
    %cst_124 = arith.constant 0.353553385 : f32
    %226 = vector.broadcast %cst_124 : f32 to vector<2x8x8xf32>
    %227 = arith.mulf %225, %226 : vector<2x8x8xf32>
    %cst_125 = arith.constant dense<0xFF800000> : vector<2x8xf32>
    %228 = vector.multi_reduction <maximumf>, %227, %cst_125 [2] : vector<2x8x8xf32> to vector<2x8xf32>
    %229 = vector.shape_cast %228 : vector<2x8xf32> to vector<2x8x1xf32>
    %230 = vector.broadcast %229 : vector<2x8x1xf32> to vector<2x8x8xf32>
    %231 = arith.subf %227, %230 : vector<2x8x8xf32>
    %232 = math.exp %231 : vector<2x8x8xf32>
    %cst_126 = arith.constant dense<0.000000e+00> : vector<2x8xf32>
    %233 = vector.multi_reduction <add>, %232, %cst_126 [2] : vector<2x8x8xf32> to vector<2x8xf32>
    %234 = vector.shape_cast %233 : vector<2x8xf32> to vector<2x8x1xf32>
    %235 = vector.broadcast %234 : vector<2x8x1xf32> to vector<2x8x8xf32>
    %236 = arith.divf %232, %235 : vector<2x8x8xf32>
    "tpu.trace_start"() <{level = 10 : i32, message = "bqk,bkd->bqd"}> : () -> ()
    %cst_127 = arith.constant dense<0.000000e+00> : vector<2x8x8xf32>
    %237 = tpu.matmul %236, %224, %cst_127 {dimension_numbers = #tpu.dot_dimension_numbers<[2], [1], [1], [2], [0, 0, 0, 1, 1, 2], [0], [0]>} : vector<2x8x8xf32>, vector<2x8x8xf32>, vector<2x8x8xf32> -> vector<2x8x8xf32>
    "tpu.trace_stop"() : () -> ()
    %238 = vector.shape_cast %237 : vector<2x8x8xf32> to vector<16x8xf32>
    %239 = vector.extract_strided_slice %201 {offsets = [0, 0], sizes = [8, 32], strides = [1, 1]} : vector<32x32xf32> to vector<8x32xf32>
    %cst_128 = arith.constant dense<0.000000e+00> : vector<16x32xf32>
    %240 = tpu.matmul %238, %239, %cst_128 {dimension_numbers = #tpu.dot_dimension_numbers<[1], [0], [0], [1], [0, 0, 1, 1], [], []>} : vector<16x8xf32>, vector<8x32xf32>, vector<16x32xf32> -> vector<16x32xf32>
    %241 = vector.extract_strided_slice %219 {offsets = [0, 0, 8], sizes = [2, 8, 8], strides = [1, 1, 1]} : vector<2x8x32xf32> to vector<2x8x8xf32>
    %242 = vector.extract_strided_slice %220 {offsets = [0, 0, 8], sizes = [2, 8, 8], strides = [1, 1, 1]} : vector<2x8x32xf32> to vector<2x8x8xf32>
    %243 = vector.extract_strided_slice %221 {offsets = [0, 0, 8], sizes = [2, 8, 8], strides = [1, 1, 1]} : vector<2x8x32xf32> to vector<2x8x8xf32>
    "tpu.trace_start"() <{level = 10 : i32, message = "bqd,bkd->bqk"}> : () -> ()
    %cst_129 = arith.constant dense<0.000000e+00> : vector<2x8x8xf32>
    %244 = tpu.matmul %241, %242, %cst_129 {dimension_numbers = #tpu.dot_dimension_numbers<[2], [2], [1], [1], [0, 0, 0, 1, 1, 1], [0], [0]>} : vector<2x8x8xf32>, vector<2x8x8xf32>, vector<2x8x8xf32> -> vector<2x8x8xf32>
    "tpu.trace_stop"() : () -> ()
    %cst_130 = arith.constant 0.353553385 : f32
    %245 = vector.broadcast %cst_130 : f32 to vector<2x8x8xf32>
    %246 = arith.mulf %244, %245 : vector<2x8x8xf32>
    %cst_131 = arith.constant dense<0xFF800000> : vector<2x8xf32>
    %247 = vector.multi_reduction <maximumf>, %246, %cst_131 [2] : vector<2x8x8xf32> to vector<2x8xf32>
    %248 = vector.shape_cast %247 : vector<2x8xf32> to vector<2x8x1xf32>
    %249 = vector.broadcast %248 : vector<2x8x1xf32> to vector<2x8x8xf32>
    %250 = arith.subf %246, %249 : vector<2x8x8xf32>
    %251 = math.exp %250 : vector<2x8x8xf32>
    %cst_132 = arith.constant dense<0.000000e+00> : vector<2x8xf32>
    %252 = vector.multi_reduction <add>, %251, %cst_132 [2] : vector<2x8x8xf32> to vector<2x8xf32>
    %253 = vector.shape_cast %252 : vector<2x8xf32> to vector<2x8x1xf32>
    %254 = vector.broadcast %253 : vector<2x8x1xf32> to vector<2x8x8xf32>
    %255 = arith.divf %251, %254 : vector<2x8x8xf32>
    "tpu.trace_start"() <{level = 10 : i32, message = "bqk,bkd->bqd"}> : () -> ()
    %cst_133 = arith.constant dense<0.000000e+00> : vector<2x8x8xf32>
    %256 = tpu.matmul %255, %243, %cst_133 {dimension_numbers = #tpu.dot_dimension_numbers<[2], [1], [1], [2], [0, 0, 0, 1, 1, 2], [0], [0]>} : vector<2x8x8xf32>, vector<2x8x8xf32>, vector<2x8x8xf32> -> vector<2x8x8xf32>
    "tpu.trace_stop"() : () -> ()
    %257 = vector.shape_cast %256 : vector<2x8x8xf32> to vector<16x8xf32>
    %258 = vector.extract_strided_slice %201 {offsets = [8, 0], sizes = [8, 32], strides = [1, 1]} : vector<32x32xf32> to vector<8x32xf32>
    %cst_134 = arith.constant dense<0.000000e+00> : vector<16x32xf32>
    %259 = tpu.matmul %257, %258, %cst_134 {dimension_numbers = #tpu.dot_dimension_numbers<[1], [0], [0], [1], [0, 0, 1, 1], [], []>} : vector<16x8xf32>, vector<8x32xf32>, vector<16x32xf32> -> vector<16x32xf32>
    %260 = vector.extract_strided_slice %219 {offsets = [0, 0, 16], sizes = [2, 8, 8], strides = [1, 1, 1]} : vector<2x8x32xf32> to vector<2x8x8xf32>
    %261 = vector.extract_strided_slice %220 {offsets = [0, 0, 16], sizes = [2, 8, 8], strides = [1, 1, 1]} : vector<2x8x32xf32> to vector<2x8x8xf32>
    %262 = vector.extract_strided_slice %221 {offsets = [0, 0, 16], sizes = [2, 8, 8], strides = [1, 1, 1]} : vector<2x8x32xf32> to vector<2x8x8xf32>
    "tpu.trace_start"() <{level = 10 : i32, message = "bqd,bkd->bqk"}> : () -> ()
    %cst_135 = arith.constant dense<0.000000e+00> : vector<2x8x8xf32>
    %263 = tpu.matmul %260, %261, %cst_135 {dimension_numbers = #tpu.dot_dimension_numbers<[2], [2], [1], [1], [0, 0, 0, 1, 1, 1], [0], [0]>} : vector<2x8x8xf32>, vector<2x8x8xf32>, vector<2x8x8xf32> -> vector<2x8x8xf32>
    "tpu.trace_stop"() : () -> ()
    %cst_136 = arith.constant 0.353553385 : f32
    %264 = vector.broadcast %cst_136 : f32 to vector<2x8x8xf32>
    %265 = arith.mulf %263, %264 : vector<2x8x8xf32>
    %cst_137 = arith.constant dense<0xFF800000> : vector<2x8xf32>
    %266 = vector.multi_reduction <maximumf>, %265, %cst_137 [2] : vector<2x8x8xf32> to vector<2x8xf32>
    %267 = vector.shape_cast %266 : vector<2x8xf32> to vector<2x8x1xf32>
    %268 = vector.broadcast %267 : vector<2x8x1xf32> to vector<2x8x8xf32>
    %269 = arith.subf %265, %268 : vector<2x8x8xf32>
    %270 = math.exp %269 : vector<2x8x8xf32>
    %cst_138 = arith.constant dense<0.000000e+00> : vector<2x8xf32>
    %271 = vector.multi_reduction <add>, %270, %cst_138 [2] : vector<2x8x8xf32> to vector<2x8xf32>
    %272 = vector.shape_cast %271 : vector<2x8xf32> to vector<2x8x1xf32>
    %273 = vector.broadcast %272 : vector<2x8x1xf32> to vector<2x8x8xf32>
    %274 = arith.divf %270, %273 : vector<2x8x8xf32>
    "tpu.trace_start"() <{level = 10 : i32, message = "bqk,bkd->bqd"}> : () -> ()
    %cst_139 = arith.constant dense<0.000000e+00> : vector<2x8x8xf32>
    %275 = tpu.matmul %274, %262, %cst_139 {dimension_numbers = #tpu.dot_dimension_numbers<[2], [1], [1], [2], [0, 0, 0, 1, 1, 2], [0], [0]>} : vector<2x8x8xf32>, vector<2x8x8xf32>, vector<2x8x8xf32> -> vector<2x8x8xf32>
    "tpu.trace_stop"() : () -> ()
    %276 = vector.shape_cast %275 : vector<2x8x8xf32> to vector<16x8xf32>
    %277 = vector.extract_strided_slice %201 {offsets = [16, 0], sizes = [8, 32], strides = [1, 1]} : vector<32x32xf32> to vector<8x32xf32>
    %cst_140 = arith.constant dense<0.000000e+00> : vector<16x32xf32>
    %278 = tpu.matmul %276, %277, %cst_140 {dimension_numbers = #tpu.dot_dimension_numbers<[1], [0], [0], [1], [0, 0, 1, 1], [], []>} : vector<16x8xf32>, vector<8x32xf32>, vector<16x32xf32> -> vector<16x32xf32>
    %279 = vector.extract_strided_slice %219 {offsets = [0, 0, 24], sizes = [2, 8, 8], strides = [1, 1, 1]} : vector<2x8x32xf32> to vector<2x8x8xf32>
    %280 = vector.extract_strided_slice %220 {offsets = [0, 0, 24], sizes = [2, 8, 8], strides = [1, 1, 1]} : vector<2x8x32xf32> to vector<2x8x8xf32>
    %281 = vector.extract_strided_slice %221 {offsets = [0, 0, 24], sizes = [2, 8, 8], strides = [1, 1, 1]} : vector<2x8x32xf32> to vector<2x8x8xf32>
    "tpu.trace_start"() <{level = 10 : i32, message = "bqd,bkd->bqk"}> : () -> ()
    %cst_141 = arith.constant dense<0.000000e+00> : vector<2x8x8xf32>
    %282 = tpu.matmul %279, %280, %cst_141 {dimension_numbers = #tpu.dot_dimension_numbers<[2], [2], [1], [1], [0, 0, 0, 1, 1, 1], [0], [0]>} : vector<2x8x8xf32>, vector<2x8x8xf32>, vector<2x8x8xf32> -> vector<2x8x8xf32>
    "tpu.trace_stop"() : () -> ()
    %cst_142 = arith.constant 0.353553385 : f32
    %283 = vector.broadcast %cst_142 : f32 to vector<2x8x8xf32>
    %284 = arith.mulf %282, %283 : vector<2x8x8xf32>
    %cst_143 = arith.constant dense<0xFF800000> : vector<2x8xf32>
    %285 = vector.multi_reduction <maximumf>, %284, %cst_143 [2] : vector<2x8x8xf32> to vector<2x8xf32>
    %286 = vector.shape_cast %285 : vector<2x8xf32> to vector<2x8x1xf32>
    %287 = vector.broadcast %286 : vector<2x8x1xf32> to vector<2x8x8xf32>
    %288 = arith.subf %284, %287 : vector<2x8x8xf32>
    %289 = math.exp %288 : vector<2x8x8xf32>
    %cst_144 = arith.constant dense<0.000000e+00> : vector<2x8xf32>
    %290 = vector.multi_reduction <add>, %289, %cst_144 [2] : vector<2x8x8xf32> to vector<2x8xf32>
    %291 = vector.shape_cast %290 : vector<2x8xf32> to vector<2x8x1xf32>
    %292 = vector.broadcast %291 : vector<2x8x1xf32> to vector<2x8x8xf32>
    %293 = arith.divf %289, %292 : vector<2x8x8xf32>
    "tpu.trace_start"() <{level = 10 : i32, message = "bqk,bkd->bqd"}> : () -> ()
    %cst_145 = arith.constant dense<0.000000e+00> : vector<2x8x8xf32>
    %294 = tpu.matmul %293, %281, %cst_145 {dimension_numbers = #tpu.dot_dimension_numbers<[2], [1], [1], [2], [0, 0, 0, 1, 1, 2], [0], [0]>} : vector<2x8x8xf32>, vector<2x8x8xf32>, vector<2x8x8xf32> -> vector<2x8x8xf32>
    "tpu.trace_stop"() : () -> ()
    %295 = vector.shape_cast %294 : vector<2x8x8xf32> to vector<16x8xf32>
    %296 = vector.extract_strided_slice %201 {offsets = [24, 0], sizes = [8, 32], strides = [1, 1]} : vector<32x32xf32> to vector<8x32xf32>
    %cst_146 = arith.constant dense<0.000000e+00> : vector<16x32xf32>
    %297 = tpu.matmul %295, %296, %cst_146 {dimension_numbers = #tpu.dot_dimension_numbers<[1], [0], [0], [1], [0, 0, 1, 1], [], []>} : vector<16x8xf32>, vector<8x32xf32>, vector<16x32xf32> -> vector<16x32xf32>
    %cst_147 = arith.constant 0.000000e+00 : f32
    %298 = vector.broadcast %cst_147 : f32 to vector<16x32xf32>
    %299 = arith.addf %298, %240 : vector<16x32xf32>
    %300 = arith.addf %299, %259 : vector<16x32xf32>
    %301 = arith.addf %300, %278 : vector<16x32xf32>
    %302 = arith.addf %301, %297 : vector<16x32xf32>
    %303 = vector.broadcast %209 : vector<1x32xf32> to vector<16x32xf32>
    %304 = arith.addf %302, %303 : vector<16x32xf32>
    %305 = arith.addf %193, %304 : vector<16x32xf32>
    %c1_148 = arith.constant 1 : index
    %c0_149 = arith.constant 0 : index
    %c0_150 = arith.constant 0 : index
    %306 = vector.load %arg16[%c1_148, %c0_149, %c0_150] : memref<2x1x32xf32, #tpu.memory_space<vmem>>, vector<1x1x32xf32>
    %307 = vector.shape_cast %306 : vector<1x1x32xf32> to vector<1x32xf32>
    %c1_151 = arith.constant 1 : index
    %c0_152 = arith.constant 0 : index
    %c0_153 = arith.constant 0 : index
    %308 = vector.load %arg17[%c1_151, %c0_152, %c0_153] : memref<2x1x32xf32, #tpu.memory_space<vmem>>, vector<1x1x32xf32>
    %309 = vector.shape_cast %308 : vector<1x1x32xf32> to vector<1x32xf32>
    %cst_154 = arith.constant dense<0.000000e+00> : vector<16xf32>
    %310 = vector.multi_reduction <add>, %305, %cst_154 [1] : vector<16x32xf32> to vector<16xf32>
    %311 = vector.shape_cast %310 : vector<16xf32> to vector<16x1xf32>
    %cst_155 = arith.constant 3.200000e+01 : f32
    %312 = vector.broadcast %cst_155 : f32 to vector<16x1xf32>
    %313 = arith.divf %311, %312 : vector<16x1xf32>
    %314 = vector.broadcast %313 : vector<16x1xf32> to vector<16x32xf32>
    %315 = arith.subf %305, %314 : vector<16x32xf32>
    %316 = arith.mulf %315, %315 : vector<16x32xf32>
    %cst_156 = arith.constant dense<0.000000e+00> : vector<16xf32>
    %317 = vector.multi_reduction <add>, %316, %cst_156 [1] : vector<16x32xf32> to vector<16xf32>
    %318 = vector.shape_cast %317 : vector<16xf32> to vector<16x1xf32>
    %cst_157 = arith.constant 3.200000e+01 : f32
    %319 = vector.broadcast %cst_157 : f32 to vector<16x1xf32>
    %320 = arith.divf %318, %319 : vector<16x1xf32>
    %321 = vector.broadcast %313 : vector<16x1xf32> to vector<16x32xf32>
    %322 = arith.subf %305, %321 : vector<16x32xf32>
    %cst_158 = arith.constant 9.99999974E-6 : f32
    %323 = vector.broadcast %cst_158 : f32 to vector<16x1xf32>
    %324 = arith.addf %320, %323 : vector<16x1xf32>
    %325 = math.rsqrt %324 : vector<16x1xf32>
    %326 = vector.broadcast %325 : vector<16x1xf32> to vector<16x32xf32>
    %327 = arith.mulf %322, %326 : vector<16x32xf32>
    %328 = vector.broadcast %307 : vector<1x32xf32> to vector<16x32xf32>
    %329 = arith.mulf %327, %328 : vector<16x32xf32>
    %330 = vector.broadcast %309 : vector<1x32xf32> to vector<16x32xf32>
    %331 = arith.addf %329, %330 : vector<16x32xf32>
    %c1_159 = arith.constant 1 : index
    %c0_160 = arith.constant 0 : index
    %c0_161 = arith.constant 0 : index
    %332 = vector.load %arg12[%c1_159, %c0_160, %c0_161] : memref<2x32x32xf32, #tpu.memory_space<vmem>>, vector<1x32x32xf32>
    %333 = vector.shape_cast %332 : vector<1x32x32xf32> to vector<32x32xf32>
    %cst_162 = arith.constant dense<0.000000e+00> : vector<16x32xf32>
    %334 = tpu.matmul %331, %333, %cst_162 {dimension_numbers = #tpu.dot_dimension_numbers<[1], [0], [0], [1], [0, 0, 1, 1], [], []>} : vector<16x32xf32>, vector<32x32xf32>, vector<16x32xf32> -> vector<16x32xf32>
    %c1_163 = arith.constant 1 : index
    %c0_164 = arith.constant 0 : index
    %c0_165 = arith.constant 0 : index
    %335 = vector.load %arg13[%c1_163, %c0_164, %c0_165] : memref<2x1x32xf32, #tpu.memory_space<vmem>>, vector<1x1x32xf32>
    %336 = vector.shape_cast %335 : vector<1x1x32xf32> to vector<1x32xf32>
    %337 = vector.broadcast %336 : vector<1x32xf32> to vector<16x32xf32>
    %338 = arith.addf %334, %337 : vector<16x32xf32>
    %cst_166 = arith.constant 0.000000e+00 : f32
    %339 = vector.broadcast %cst_166 : f32 to vector<16x32xf32>
    %340 = arith.maximumf %338, %339 : vector<16x32xf32>
    %c1_167 = arith.constant 1 : index
    %c0_168 = arith.constant 0 : index
    %c0_169 = arith.constant 0 : index
    %341 = vector.load %arg14[%c1_167, %c0_168, %c0_169] : memref<2x32x32xf32, #tpu.memory_space<vmem>>, vector<1x32x32xf32>
    %342 = vector.shape_cast %341 : vector<1x32x32xf32> to vector<32x32xf32>
    %cst_170 = arith.constant dense<0.000000e+00> : vector<16x32xf32>
    %343 = tpu.matmul %340, %342, %cst_170 {dimension_numbers = #tpu.dot_dimension_numbers<[1], [0], [0], [1], [0, 0, 1, 1], [], []>} : vector<16x32xf32>, vector<32x32xf32>, vector<16x32xf32> -> vector<16x32xf32>
    %c1_171 = arith.constant 1 : index
    %c0_172 = arith.constant 0 : index
    %c0_173 = arith.constant 0 : index
    %344 = vector.load %arg15[%c1_171, %c0_172, %c0_173] : memref<2x1x32xf32, #tpu.memory_space<vmem>>, vector<1x1x32xf32>
    %345 = vector.shape_cast %344 : vector<1x1x32xf32> to vector<1x32xf32>
    %346 = vector.broadcast %345 : vector<1x32xf32> to vector<16x32xf32>
    %347 = arith.addf %343, %346 : vector<16x32xf32>
    %348 = arith.addf %331, %347 : vector<16x32xf32>
    %c1_174 = arith.constant 1 : index
    %c0_175 = arith.constant 0 : index
    %c0_176 = arith.constant 0 : index
    %349 = vector.load %arg18[%c1_174, %c0_175, %c0_176] : memref<2x1x32xf32, #tpu.memory_space<vmem>>, vector<1x1x32xf32>
    %350 = vector.shape_cast %349 : vector<1x1x32xf32> to vector<1x32xf32>
    %c1_177 = arith.constant 1 : index
    %c0_178 = arith.constant 0 : index
    %c0_179 = arith.constant 0 : index
    %351 = vector.load %arg19[%c1_177, %c0_178, %c0_179] : memref<2x1x32xf32, #tpu.memory_space<vmem>>, vector<1x1x32xf32>
    %352 = vector.shape_cast %351 : vector<1x1x32xf32> to vector<1x32xf32>
    %cst_180 = arith.constant dense<0.000000e+00> : vector<16xf32>
    %353 = vector.multi_reduction <add>, %348, %cst_180 [1] : vector<16x32xf32> to vector<16xf32>
    %354 = vector.shape_cast %353 : vector<16xf32> to vector<16x1xf32>
    %cst_181 = arith.constant 3.200000e+01 : f32
    %355 = vector.broadcast %cst_181 : f32 to vector<16x1xf32>
    %356 = arith.divf %354, %355 : vector<16x1xf32>
    %357 = vector.broadcast %356 : vector<16x1xf32> to vector<16x32xf32>
    %358 = arith.subf %348, %357 : vector<16x32xf32>
    %359 = arith.mulf %358, %358 : vector<16x32xf32>
    %cst_182 = arith.constant dense<0.000000e+00> : vector<16xf32>
    %360 = vector.multi_reduction <add>, %359, %cst_182 [1] : vector<16x32xf32> to vector<16xf32>
    %361 = vector.shape_cast %360 : vector<16xf32> to vector<16x1xf32>
    %cst_183 = arith.constant 3.200000e+01 : f32
    %362 = vector.broadcast %cst_183 : f32 to vector<16x1xf32>
    %363 = arith.divf %361, %362 : vector<16x1xf32>
    %364 = vector.broadcast %356 : vector<16x1xf32> to vector<16x32xf32>
    %365 = arith.subf %348, %364 : vector<16x32xf32>
    %cst_184 = arith.constant 9.99999974E-6 : f32
    %366 = vector.broadcast %cst_184 : f32 to vector<16x1xf32>
    %367 = arith.addf %363, %366 : vector<16x1xf32>
    %368 = math.rsqrt %367 : vector<16x1xf32>
    %369 = vector.broadcast %368 : vector<16x1xf32> to vector<16x32xf32>
    %370 = arith.mulf %365, %369 : vector<16x32xf32>
    %371 = vector.broadcast %350 : vector<1x32xf32> to vector<16x32xf32>
    %372 = arith.mulf %370, %371 : vector<16x32xf32>
    %373 = vector.broadcast %352 : vector<1x32xf32> to vector<16x32xf32>
    %374 = arith.addf %372, %373 : vector<16x32xf32>
    %375 = vector.shape_cast %374 : vector<16x32xf32> to vector<2x8x32xf32>
    %376 = vector.extract_strided_slice %375 {offsets = [0, 7, 0], sizes = [2, 1, 32], strides = [1, 1, 1]} : vector<2x8x32xf32> to vector<2x1x32xf32>
    %377 = vector.shape_cast %376 : vector<2x1x32xf32> to vector<2x32xf32>
    %378 = vector.extract_strided_slice %0 {offsets = [0, 7, 0], sizes = [2, 1, 4], strides = [1, 1, 1]} : vector<2x8x4xf32> to vector<2x1x4xf32>
    %379 = vector.shape_cast %378 : vector<2x1x4xf32> to vector<2x4xf32>
    %c0_185 = arith.constant 0 : index
    %c0_186 = arith.constant 0 : index
    %380 = vector.load %arg20[%c0_185, %c0_186] : memref<4x32xf32, #tpu.memory_space<vmem>>, vector<4x32xf32>
    %cst_187 = arith.constant dense<0.000000e+00> : vector<2x32xf32>
    %381 = tpu.matmul %379, %380, %cst_187 {dimension_numbers = #tpu.dot_dimension_numbers<[1], [0], [0], [1], [0, 0, 1, 1], [], []>} : vector<2x4xf32>, vector<4x32xf32>, vector<2x32xf32> -> vector<2x32xf32>
    %c0_188 = arith.constant 0 : index
    %c0_189 = arith.constant 0 : index
    %382 = vector.load %arg21[%c0_188, %c0_189] : memref<1x32xf32, #tpu.memory_space<vmem>>, vector<1x32xf32>
    %383 = vector.broadcast %382 : vector<1x32xf32> to vector<2x32xf32>
    %384 = arith.addf %381, %383 : vector<2x32xf32>
    %c0_190 = arith.constant 0 : index
    %c0_191 = arith.constant 0 : index
    %385 = vector.load %arg22[%c0_190, %c0_191] : memref<64x32xf32, #tpu.memory_space<vmem>>, vector<64x32xf32>
    %386 = vector.extract_strided_slice %385 {offsets = [0, 0], sizes = [32, 32], strides = [1, 1]} : vector<64x32xf32> to vector<32x32xf32>
    %cst_192 = arith.constant dense<0.000000e+00> : vector<2x32xf32>
    %387 = tpu.matmul %377, %386, %cst_192 {dimension_numbers = #tpu.dot_dimension_numbers<[1], [0], [0], [1], [0, 0, 1, 1], [], []>} : vector<2x32xf32>, vector<32x32xf32>, vector<2x32xf32> -> vector<2x32xf32>
    %388 = vector.extract_strided_slice %385 {offsets = [32, 0], sizes = [32, 32], strides = [1, 1]} : vector<64x32xf32> to vector<32x32xf32>
    %cst_193 = arith.constant dense<0.000000e+00> : vector<2x32xf32>
    %389 = tpu.matmul %384, %388, %cst_193 {dimension_numbers = #tpu.dot_dimension_numbers<[1], [0], [0], [1], [0, 0, 1, 1], [], []>} : vector<2x32xf32>, vector<32x32xf32>, vector<2x32xf32> -> vector<2x32xf32>
    %390 = arith.addf %387, %389 : vector<2x32xf32>
    %c0_194 = arith.constant 0 : index
    %c0_195 = arith.constant 0 : index
    %391 = vector.load %arg23[%c0_194, %c0_195] : memref<1x32xf32, #tpu.memory_space<vmem>>, vector<1x32xf32>
    %392 = vector.broadcast %391 : vector<1x32xf32> to vector<2x32xf32>
    %393 = arith.addf %390, %392 : vector<2x32xf32>
    %cst_196 = arith.constant 0.000000e+00 : f32
    %394 = vector.broadcast %cst_196 : f32 to vector<2x32xf32>
    %395 = arith.maximumf %393, %394 : vector<2x32xf32>
    %c0_197 = arith.constant 0 : index
    %c0_198 = arith.constant 0 : index
    %396 = vector.load %arg24[%c0_197, %c0_198] : memref<32x3xf32, #tpu.memory_space<vmem>>, vector<32x3xf32>
    %cst_199 = arith.constant dense<0.000000e+00> : vector<2x3xf32>
    %397 = tpu.matmul %395, %396, %cst_199 {dimension_numbers = #tpu.dot_dimension_numbers<[1], [0], [0], [1], [0, 0, 1, 1], [], []>} : vector<2x32xf32>, vector<32x3xf32>, vector<2x3xf32> -> vector<2x3xf32>
    %c0_200 = arith.constant 0 : index
    %c0_201 = arith.constant 0 : index
    %398 = vector.load %arg25[%c0_200, %c0_201] : memref<1x3xf32, #tpu.memory_space<vmem>>, vector<1x3xf32>
    %399 = vector.broadcast %398 : vector<1x3xf32> to vector<2x3xf32>
    %400 = arith.addf %397, %399 : vector<2x3xf32>
    %c0_202 = arith.constant 0 : index
    %c0_203 = arith.constant 0 : index
    %401 = vector.load %arg26[%c0_202, %c0_203] : memref<2x3xf32, #tpu.memory_space<vmem>>, vector<2x3xf32>
    tpu.vector_store %arg26[%c0_202, %c0_203], %400 {strides = array<i32>} : memref<2x3xf32, #tpu.memory_space<vmem>>, vector<2x3xf32>,
    return
  }
}

</mosaic_0001>

<bundles_post_ra>
// kernel: tpu_custom_call.1
= control target key start
LH: loop header
LB: loop body
LE: loop exit
PB: predicated region body
PF: predicated region fallthrough
CT: control target
= control target key end

     0   :  { %s6786_s0 = inlined_call_operand.vmem [shape: f32[2,8,4], index: 0, kind: input, shape index: {}]   ;;  %s6787_s1 = inlined_call_operand.hbm [shape: f32[8,32], index: 1, kind: input, shape index: {}]   ;;  %s6788_s2 = inlined_call_operand.hbm [shape: f32[4,32], index: 2, kind: input, shape index: {}]   ;;  %s6789_s3 = inlined_call_operand.hbm [shape: f32[1,32], index: 3, kind: input, shape index: {}]   ;;  %s6790_s4 = inlined_call_operand.vmem [shape: f32[2,32,32], index: 4, kind: input, shape index: {}]   ;;  %s6791_s5 = inlined_call_operand.hbm [shape: f32[2,1,32], index: 5, kind: input, shape index: {}]   ;;  %s6792_s6 = inlined_call_operand.vmem [shape: f32[2,32,32], index: 6, kind: input, shape index: {}]   ;;  %s6793_s7 = inlined_call_operand.vmem [shape: f32[2,1,32], index: 7, kind: input, shape index: {}]   ;;  %s6794_s8 = inlined_call_operand.hbm [shape: f32[2,32,32], index: 8, kind: input, shape index: {}]   ;;  %s6795_s9 = inlined_call_operand.vmem [shape: f32[2,1,32], index: 9, kind: input, shape index: {}]   ;;  %s6796_s10 = inlined_call_operand.hbm [shape: f32[2,32,32], index: 10, kind: input, shape index: {}]   ;;  %s6797_s11 = inlined_call_operand.vmem [shape: f32[2,1,32], index: 11, kind: input, shape index: {}]   ;;  %s6798_s12 = inlined_call_operand.hbm [shape: f32[2,32,32], index: 12, kind: input, shape index: {}]   ;;  %s6799_s13 = inlined_call_operand.vmem [shape: f32[2,1,32], index: 13, kind: input, shape index: {}]   ;;  %s6800_s14 = inlined_call_operand.hbm [shape: f32[2,32,32], index: 14, kind: input, shape index: {}]   ;;  %s6801_s15 = inlined_call_operand.vmem [shape: f32[2,1,32], index: 15, kind: input, shape index: {}]   ;;  %s6802_s16 = inlined_call_operand.vmem [shape: f32[2,1,32], index: 16, kind: input, shape index: {}]   ;;  %s6803_s17 = inlined_call_operand.vmem [shape: f32[2,1,32], index: 17, kind: input, shape index: {}]   ;;  %s6804_s18 = inlined_call_operand.vmem [shape: f32[2,1,32], index: 18, kind: input, shape index: {}]   ;;  %s6805_s19 = inlined_call_operand.vmem [shape: f32[2,1,32], index: 19, kind: input, shape index: {}]   ;;  %s6806_s20 = inlined_call_operand.vmem [shape: f32[4,32], index: 20, kind: input, shape index: {}]   ;;  %s6807_s21 = inlined_call_operand.vmem [shape: f32[1,32], index: 21, kind: input, shape index: {}]   ;;  %s6808_s22 = inlined_call_operand.vmem [shape: f32[64,32], index: 22, kind: input, shape index: {}]   ;;  %s6809_s23 = inlined_call_operand.vmem [shape: f32[1,32], index: 23, kind: input, shape index: {}]   ;;  %s6810_s24 = inlined_call_operand.vmem [shape: f32[32,3], index: 24, kind: input, shape index: {}]   ;;  %s6811_s25 = inlined_call_operand.vmem [shape: f32[1,3], index: 25, kind: input, shape index: {}]   ;;  %s6812_s26 = inlined_call_operand.hbm [shape: f32[2,3], index: 26, kind: output, shape index: {}]  }
   0x1   :  { %6818 = sst [smem:[#allocation23_spill]] %s6786_s0 }
   0x2   :  { %6819 = sst [smem:[#allocation24_spill]] %s6787_s1 }
   0x3   :  { %6820 = sst [smem:[#allocation25_spill]] %s6788_s2 }
   0x4   :  { %6821 = sst [smem:[#allocation26_spill]] %s6789_s3 }
   0x5   :  { %6822 = sst [smem:[#allocation27_spill]] %s6790_s4 }
   0x6   :  { %6823 = sst [smem:[#allocation28_spill]] %s6791_s5 }
   0x7   :  { %6824 = sst [smem:[#allocation29_spill]] %s6792_s6 }
   0x8   :  { %6825 = sst [smem:[#allocation30_spill]] %s6793_s7 }
   0x9   :  { %6826 = sst [smem:[#allocation31_spill]] %s6794_s8 }
   0xa   :  { %6827 = sst [smem:[#allocation32_spill]] %s6795_s9 }
   0xb   :  { %6828 = sst [smem:[#allocation33_spill]] %s6796_s10 }
   0xc   :  { %6829 = sst [smem:[#allocation34_spill]] %s6812_s26 }
   0xd   :  { %31 = vsyncpa [#allocation3], 0 }
   0xe   :  { %32 = vsyncpa [#allocation6], 0 }
   0xf   :  { %33 = vsyncpa [#allocation9], 0 }
  0x10   :  { %34 = vsyncpa [#allocation12], 0 }
  0x11   :  { %35 = vsyncpa [#allocation15], 0 }
  0x12   :  { %36 = vsyncpa [#allocation4], 0  ;;  %s6016_s27 = smov [#allocation5]   ;;  %s6017_s7 = smov [#allocation8]  }
  0x13   :  { %s55_s3 = sshll.u32 %s6016_s27, 4  ;;  %s76_s28 = sshll.u32 %s6017_s7, 4  ;;  %s56_s3 = int_to_ptr.vmem [resolvable:$true] %s55_s3  ;;  %s77_s28 = int_to_ptr.vmem [resolvable:$true] %s76_s28 }
  0x14   :  { %s5832_s8 = scalar_lea.vmem %s56_s3, 64  ;;  %p5837_p1 = scmp.lt.s32.totalorder %s56_s3, %s56_s3 }
  0x15   :  { %p5833_p0 = scmp.ne.s32.totalorder %s56_s3, %s5832_s8  ;;  %p5838_p2 = scmp.lt.s32.totalorder %s5832_s8, %s5832_s8 }
  0x17   :  { %p5839_p3 = por %p5838_p2, %p5837_p1 }
  0x19   :  { %p5840_p4 = pnand %p5839_p3, %p5833_p0 }
  0x1b   :  { %5843 = shalt.err (!%p5840_p4)
}
  0x1c   :  { %s6830_s0 = sld [smem:[#allocation25_spill]]  ;;  %s5852_s9 = scalar_lea.vmem %s77_s28, 32 }
  0x1d   :  { %p5853_p5 = scmp.ne.s32.totalorder %s77_s28, %s5852_s9  ;;  %p5857_p6 = scmp.lt.s32.totalorder %s77_s28, %s77_s28 }
  0x1e   :  { %p5858_p7 = scmp.lt.s32.totalorder %s5852_s9, %s5852_s9 }
  0x20   :  { %p5859_p8 = por %p5858_p7, %p5857_p6 }
  0x22   :  { %58 = dma.hbm_to_vmem [thread:$0]  %s6830_s0, 64, %s56_s3, [#allocation6]  }
  0x23   :  { %p5860_p9 = pnand %p5859_p8, %p5853_p5 }
  0x25   :  { %5863 = shalt.err (!%p5860_p9)
}
  0x26   :  { %s6018_s30 = smov 16   ;;  %s6019_s2 = smov 1  }
  0x27   :  { %s6831_s6 = sld [smem:[#allocation28_spill]]  ;;  %s6020_s1 = smov [#allocation11]  }
  0x28   :  { %s106_s27 = sshll.u32 %s6020_s1, 4  ;;  %s6021_s7 = smov [#allocation2]   ;;  %s107_s27 = int_to_ptr.vmem [resolvable:$true] %s106_s27 }
  0x29   :  { %s45_s8 = sshll.u32 %s6021_s7, 4  ;;  %s5872_s3 = scalar_lea.vmem %s107_s27, 1024  ;;  %s46_s8 = int_to_ptr.vmem [resolvable:$true] %s45_s8 }
  0x2a   :  { %p5873_p10 = scmp.ne.s32.totalorder %s107_s27, %s5872_s3  ;;  %p5877_p11 = scmp.lt.s32.totalorder %s107_s27, %s107_s27 }
  0x2b   :  { %p5878_p12 = scmp.lt.s32.totalorder %s5872_s3, %s5872_s3 }
  0x2d   :  { %82 = dma.hbm_to_vmem [thread:$0]  %s6831_s6, 32, %s77_s28, [#allocation9], %s6018_s30, %s6018_s30, %s6019_s2  }
  0x2e   :  { %p5879_p13 = por %p5878_p12, %p5877_p11 }
  0x30   :  { %p5880_p0 = pnand %p5879_p13, %p5873_p10 }
  0x32   :  { %5883 = shalt.err (!%p5880_p0)
}
  0x33   :  { %s6022_s4 = smov 128   ;;  %s6023_s29 = smov 8  }
  0x34   :  { %s6832_s9 = sld [smem:[#allocation33_spill]]  ;;  %s5892_s30 = scalar_lea.vmem %s46_s8, 128 }
  0x35   :  { %p5893_p1 = scmp.ne.s32.totalorder %s46_s8, %s5892_s30  ;;  %p5897_p2 = scmp.lt.s32.totalorder %s46_s8, %s46_s8 }
  0x36   :  { %p5898_p3 = scmp.lt.s32.totalorder %s5892_s30, %s5892_s30 }
  0x38   :  { %p5899_p4 = por %p5898_p3, %p5897_p2 }
  0x3a   :  { %112 = dma.hbm_to_vmem [thread:$0]  %s6832_s9, 1024, %s107_s27, [#allocation12], %s6022_s4, %s6022_s4, %s6023_s29  }
  0x3b   :  { %p5900_p5 = pnand %p5899_p4, %p5893_p1 }
  0x3d   :  { %5903 = shalt.err (!%p5900_p5)
}
  0x3e   :  { %s6833_s10 = sld [smem:[#allocation24_spill]]  ;;  %s6024_s6 = smov [#allocation7]  }
  0x3f   :  { %s65_s1 = sshll.u32 %s6024_s6, 4  ;;  %s6025_s7 = smov [#allocation10]   ;;  %s66_s1 = int_to_ptr.vmem [resolvable:$true] %s65_s1 }
  0x40   :  { %s92_s3 = sshll.u32 %s6025_s7, 4  ;;  %s5912_s26 = scalar_lea.vmem %s66_s1, 16  ;;  %s93_s3 = int_to_ptr.vmem [resolvable:$true] %s92_s3 }
  0x41   :  { %p5913_p6 = scmp.ne.s32.totalorder %s66_s1, %s5912_s26  ;;  %s5916_s27 = scalar_lea.vmem %s66_s1, 32 }
  0x42   :  { %p5917_p7 = scmp.lt.s32.totalorder %s66_s1, %s66_s1  ;;  %p5918_p8 = scmp.lt.s32.totalorder %s5916_s27, %s5912_s26 }
  0x44   :  { %48 = dma.hbm_to_vmem [thread:$0]  %s6833_s10, 128, %s46_s8, [#allocation3]  }
  0x45   :  { %p5919_p9 = por %p5918_p8, %p5917_p7 }
  0x47   :  { %p5920_p10 = pnand %p5919_p9, %p5913_p6 }
  0x49   :  { %5923 = shalt.err (!%p5920_p10)
}
  0x4a   :  { %s6834_s9 = sld [smem:[#allocation26_spill]]  ;;  %s5932_s30 = scalar_lea.vmem %s93_s3, 1024 }
  0x4b   :  { %p5933_p11 = scmp.ne.s32.totalorder %s93_s3, %s5932_s30  ;;  %p5937_p12 = scmp.lt.s32.totalorder %s93_s3, %s93_s3 }
  0x4c   :  { %p5938_p13 = scmp.lt.s32.totalorder %s5932_s30, %s5932_s30 }
  0x4e   :  { %p5939_p0 = por %p5938_p13, %p5937_p12 }
  0x50   :  { %68 = dma.hbm_to_vmem [thread:$0]  %s6834_s9, 16, %s66_s1, [#allocation6]  }
  0x51   :  { %p5940_p1 = pnand %p5939_p0, %p5933_p11 }
  0x53   :  { %5943 = shalt.err (!%p5940_p1)
}
  0x54   :  { %s6835_s26 = sld [smem:[#allocation31_spill]]  ;;  %s6026_s5 = smov [#allocation13]  }
  0x55   :  { %s120_s10 = sshll.u32 %s6026_s5, 4  ;;  %s6027_s6 = smov [#allocation14]   ;;  %s121_s10 = int_to_ptr.vmem [resolvable:$true] %s120_s10 }
  0x56   :  { %s134_s7 = sshll.u32 %s6027_s6, 4  ;;  %s5952_s1 = scalar_lea.vmem %s121_s10, 1024  ;;  %s135_s7 = int_to_ptr.vmem [resolvable:$true] %s134_s7 }
  0x57   :  { %p5953_p2 = scmp.ne.s32.totalorder %s121_s10, %s5952_s1  ;;  %p5957_p3 = scmp.lt.s32.totalorder %s121_s10, %s121_s10 }
  0x58   :  { %p5958_p4 = scmp.lt.s32.totalorder %s5952_s1, %s5952_s1 }
  0x5a   :  { %98 = dma.hbm_to_vmem [thread:$0]  %s6835_s26, 1024, %s93_s3, [#allocation9], %s6022_s4, %s6022_s4, %s6023_s29  }
  0x5b   :  { %p5959_p5 = por %p5958_p4, %p5957_p3 }
  0x5d   :  { %p5960_p6 = pnand %p5959_p5, %p5953_p2 }
  0x5f   :  { %5963 = shalt.err (!%p5960_p6)
}
  0x60   :  { %126 = dma.hbm_to_vmem [thread:$0]  %s6798_s12, 1024, %s121_s10, [#allocation12], %s6022_s4, %s6022_s4, %s6023_s29  }
  0x61   :  { %s5972_s3 = scalar_lea.vmem %s135_s7, 1024  ;;  %p5977_p8 = scmp.lt.s32.totalorder %s135_s7, %s135_s7 }
  0x62   :  { %p5973_p7 = scmp.ne.s32.totalorder %s135_s7, %s5972_s3  ;;  %p5978_p9 = scmp.lt.s32.totalorder %s5972_s3, %s5972_s3 }
  0x64   :  { %p5979_p10 = por %p5978_p9, %p5977_p8 }
  0x66   :  { %p5980_p11 = pnand %p5979_p10, %p5973_p7 }
  0x68   :  { %5983 = shalt.err (!%p5980_p11)
}
  0x69   :  { %140 = dma.hbm_to_vmem [thread:$0]  %s6800_s14, 1024, %s135_s7, [#allocation15], %s6022_s4, %s6022_s4, %s6023_s29  }
  0x6a   :  { %6004 = dma.done.wait [#allocation3], 128  }
  0x6b   :  { %6005 = vsyncadd [#allocation3], 4294967168 }
  0x6c   :  { %6006 = dma.done.wait [#allocation6], 80  }
  0x6d   :  { %6007 = vsyncadd [#allocation6], 4294967216 }
  0x6e   :  { %6008 = dma.done.wait [#allocation9], 1056  }
  0x6f   :  { %6009 = vsyncadd [#allocation9], 4294966240 }
  0x70   :  { %6010 = dma.done.wait [#allocation12], 2048  }
  0x71   :  { %6011 = vsyncadd [#allocation12], 4294965248 }
  0x72   :  { %6012 = dma.done.wait [#allocation15], 1024  }
  0x73   :  { %6013 = vsyncadd [#allocation15], 4294966272  ;;  %vm205_vm0 = vcmask 1043456   ;;  %vm198_vm1 = vcmask 31744   ;;  %v190_v0 = vld [vmem:[#allocation5] sm:$0xf] }
  0x74   :  { %s6836_s8 = sld [smem:[#allocation23_spill]]  ;;  %5371 = vmatprep.subr.msk.mxu1 %vm205_vm0, %v190_v0  ;;  %v297_v11 = vld [vmem:[#allocation10 + $0x18] sm:$0xff]  ;;  %v189_v16 = vld [vmem:[#allocation2] sm:$0xff]  ;;  %vm312_vm2 = vcmask 261120   ;;  %v295_v21 = vld [vmem:[#allocation10 + $0x8] sm:$0xff]  ;;  %v6028_v23 = vmov 0.0  }
  0x75   :  { %s6837_s29 = sld [smem:[#allocation27_spill]]  ;;  %5372 = vmatpush3.msk.msra.mxu1 %vm205_vm0, %v190_v0  ;;  %v5070_v12 = vld [vmem:[#allocation7] ss:$0 sm:$0xff]  ;;  %v296_v20 = vld [vmem:[#allocation10 + $0x10] sm:$0xff]  ;;  %v294_v22 = vld [vmem:[#allocation10] sm:$0xff]  ;;  %vm6029_vm3 = vmmov 0  }
  0x76   :  { %s6838_s6 = sld [smem:[#allocation29_spill]]  ;;  %vm556_vm4 = vcmask 64512   ;;  %s6030_s7 = smov 120   ;;  %v5074_v31 = vld [vmem:[#allocation8] ss:$0 sm:$0xff]  ;;  %vm4721_vm5 = vcmask 1041409  }
  0x77   :  { %s6839_s10 = sld [smem:[#allocation30_spill]]  ;;  %s6031_s3 = smov 112   ;;  %vm5049_vm6 = vcmask 17408  }
  0x78   :  { %s6840_s0 = sld [smem:[#allocation32_spill]]  ;;  %s6032_s28 = smov 104  }
  0x79   :  { %s6033_s9 = smov [#allocation16]  }
  0x7a   :  { %v187_v1 = vld [vmem:[%s6836_s8] sm:$0xff]  ;;  %v188_v2 = vld [vmem:[%s6836_s8 + $0x8] sm:$0xff] }
  0x7b   :  { %5373 = vmatprep.mubr.msk.f32.mxu1 %vm198_vm1, %v187_v1  ;;  %v289_v3 = vld [vmem:[%s6837_s29 + $0x18] sm:$0xff]  ;;  %v288_v5 = vld [vmem:[%s6837_s29 + $0x10] sm:$0xff]  ;;  %v287_v7 = vld [vmem:[%s6837_s29 + $0x8] sm:$0xff] }
  0x7c   :  { %5374 = vmatmul.mubr.msk.f32.vlgmr.msra.gmra.mxu1 %vm198_vm1, %v188_v2  ;;  %5376 = vmatprep.subr.mxu1 %v289_v3  ;;  %v293_v4 = vld [vmem:[%s6838_s6 + $0x18] sm:$0xff]  ;;  %v292_v6 = vld [vmem:[%s6838_s6 + $0x10] sm:$0xff]  ;;  %v291_v8 = vld [vmem:[%s6838_s6 + $0x8] sm:$0xff] }
  0x7d   :  { %5377 = vmatpush3.msra.mxu1 %v289_v3  ;;  %5387 = vmatprep.subr.mxu0 %v293_v4  ;;  %v286_v9 = vld [vmem:[%s6837_s29] sm:$0xff] }
  0x7e   :  { %5378 = vmatprep.subr.mxu1 %v288_v5  ;;  %5388 = vmatpush3.msra.mxu0 %v293_v4  ;;  %v290_v10 = vld [vmem:[%s6838_s6] sm:$0xff] }
  0x7f   :  { %5379 = vmatpush3.msra.mxu1 %v288_v5  ;;  %5389 = vmatprep.subr.mxu0 %v292_v6  ;;  %v5077_v24 = vld [vmem:[%s6839_s10] ss:$0 sm:$0xff] }
  0x80   :  { %5380 = vmatprep.subr.mxu1 %v287_v7  ;;  %5390 = vmatpush3.msra.mxu0 %v292_v6  ;;  %v5080_v34 = vld [vmem:[%s6840_s0] ss:$0 sm:$0xff] }
  0x81   :  { %5381 = vmatpush3.msra.mxu1 %v287_v7  ;;  %5391 = vmatprep.subr.mxu0 %v291_v8 }
  0x82   :  { %5382 = vmatprep.subr.mxu1 %v286_v9  ;;  %5392 = vmatpush3.msra.mxu0 %v291_v8 }
  0x83   :  { %5383 = vmatpush3.msra.mxu1 %v286_v9  ;;  %5393 = vmatprep.subr.mxu0 %v290_v10 }
  0x84   :  { %5394 = vmatpush3.msra.mxu0 %v290_v10  ;;  %5398 = vmatprep.subr.mxu1 %v297_v11 }
  0x85   :  { %5409 = vmatprep.subr.mxu0 %v6028_v23 }
 0x13c   :  { %v5375_v13 = vpop.f32.mrf.mxu1 }
 0x13d   :  { %v281_v14 = vadd.f32 %v5375_v13, %v5070_v12 }
 0x13e   :  { %v275_v15 = vpop.f32.mrf.mxu1 }
 0x13f   :  { %v276_v17 = vadd.f32 %v5070_v12, %v275_v15  ;;  %v6241_v19 = vadd.f32 %v281_v14, %v189_v16 }
 0x141   :  { %v6239_v18 = vadd.f32 %v276_v17, %v189_v16 }
 0x143   :  { %5384 = vmatprep.mubr.msk.f32.mxu1 %vm312_vm2, %v6239_v18  ;;  %5395 = vmatprep.mubr.msk.f32.mxu0 %vm312_vm2, %v6239_v18 }
 0x144   :  { %5385 = vmatmul.mubr.msk.f32.vlgmr.msra.gmra.mxu1 %vm312_vm2, %v6241_v19  ;;  %5396 = vmatmul.mubr.msk.f32.vlgmr.msra.gmra.mxu0 %vm312_vm2, %v6241_v19 }
 0x145   :  { %5399 = vmatpush3.msra.mxu1 %v297_v11  ;;  %5406 = vmatprep.mubr.msk.f32.mxu1 %vm312_vm2, %v6239_v18 }
 0x146   :  { %5400 = vmatprep.subr.mxu1 %v296_v20  ;;  %5411 = vmatprep.mubr.msk.f32.mxu0 %vm6029_vm3, %v6028_v23 }
 0x147   :  { %5401 = vmatpush3.msra.mxu1 %v296_v20 }
 0x148   :  { %5402 = vmatprep.subr.mxu1 %v295_v21 }
 0x149   :  { %5403 = vmatpush3.msra.mxu1 %v295_v21 }
 0x14a   :  { %5404 = vmatprep.subr.mxu1 %v294_v22 }
 0x14b   :  { %5405 = vmatpush3.msra.mxu1 %v294_v22 }
 0x14c   :  { %5407 = vmatmul.mubr.msk.f32.vlgmr.msra.gmra.mxu1 %vm312_vm2, %v6241_v19  ;;  %5419 = vmatprep.subr.mxu1 %v6028_v23 }
 0x14d   :  { %5421 = vmatprep.mubr.msk.f32.mxu1 %vm6029_vm3, %v6028_v23 }
 0x204   :  { %v5386_v25 = vpop.f32.mrf.mxu1  ;;  %v5397_v26 = vpop.f32.mrf.mxu0 }
 0x205   :  { %v6264_v27 = vadd.f32 %v5397_v26, %v5077_v24  ;;  %v6286_v35 = vadd.f32 %v5386_v25, %v5074_v31 }
 0x206   :  { %v385_v28 = vpop.f32.mrf.mxu1  ;;  %v466_v29 = vpop.f32.mrf.mxu0 }
 0x207   :  { %v6266_v30 = vadd.f32 %v5077_v24, %v466_v29  ;;  %959 = vrot.lane.b32.xlu1 %v6264_v27, %s6030_s7  ;;  %v6270_v32 = vadd.f32 %v5074_v31, %v385_v28 }
 0x209   :  { %5410 = vmatpush3.xpose.msk.msra.mxu0 %vm556_vm4, %v6266_v30 }
 0x20a   :  { %5414 = vmatprep.subr.mxu0 %v6028_v23 }
 0x20b   :  { %879 = vrot.lane.b32.xlu1 %v6270_v32, %s6030_s7 }
 0x20c   :  { %v5408_v33 = vpop.f32.mrf.mxu1  ;;  %5412 = vmatmul.mubr.msk.f32.vlgmr.msra.gmra.mxu0 %vm556_vm4, %v6270_v32 }
 0x20d   :  { %5415 = vmatpush3.xpose.msk.msra.mxu0 %vm556_vm4, %v6264_v27  ;;  %5416 = vmatprep.mubr.msk.f32.mxu0 %vm6029_vm3, %v6028_v23  ;;  %v6289_v37 = vadd.f32 %v5408_v33, %v5080_v34 }
 0x20e   :  { %v547_v36 = vpop.f32.mrf.mxu1  ;;  %5424 = vmatprep.subr.mxu0 %v6028_v23 }
 0x20f   :  { %v6291_v38 = vadd.f32 %v5080_v34, %v547_v36 }
 0x210   :  { %5417 = vmatmul.mubr.msk.f32.vlgmr.msra.gmra.mxu0 %vm556_vm4, %v6286_v35 }
 0x211   :  { %5420 = vmatpush3.msra.mxu1 %v6291_v38  ;;  %5425 = vmatpush3.msra.mxu0 %v6289_v37 }
 0x212   :  { %5429 = vmatprep.subr.mxu1 %v6028_v23  ;;  %5426 = vmatprep.mubr.msk.f32.mxu0 %vm6029_vm3, %v6028_v23 }
 0x213   :  { %5434 = vmatprep.subr.mxu0 %v6028_v23 }
 0x279   :  { %v960_v57 = vpop.permute.xlu1 %959 }
 0x27d   :  { %v880_v58 = vpop.permute.xlu1 %879 }
 0x2cc   :  { %v629_v39 = vpop.f32.mrf.mxu0 }
 0x2cd   :  { %v709_v40 = vmul.f32 0.35355338, %v629_v39 }
 0x2ce   :  { %v5413_v41 = vpop.f32.mrf.mxu0 }
 0x2cf   :  { %v711_v42 = vsel %vm556_vm4, %v709_v40, -inf }
 0x2d0   :  { %712 = vmax.xlane.f32.xlu0 %v711_v42  ;;  %v705_v43 = vpop.f32.mrf.mxu0 }
 0x2d1   :  { %v710_v44 = vmul.f32 0.35355338, %v705_v43 }
 0x2d2   :  { %v5418_v45 = vpop.f32.mrf.mxu0 }
 0x2d3   :  { %v714_v46 = vsel %vm556_vm4, %v710_v44, -inf }
 0x2d4   :  { %715 = vmax.xlane.f32.xlu0 %v714_v46 }
 0x2ea   :  { %881 = vrot.lane.b32.xlu0 %v6266_v30, %s6030_s7 }
 0x359   :  { %v713_v47 = vpop.xlane.xlu0 %712 }
 0x35a   :  { %v717_v48 = vsub.f32 %v709_v40, %v713_v47 }
 0x35c   :  { %v719_v49 = vmul.f32 1.442695, %v717_v48 }
 0x35d   :  { %v716_v50 = vpop.xlane.xlu0 %715 }
 0x35e   :  { %5742 = vpow2.f32 %v719_v49  ;;  %v718_v51 = vsub.f32 %v710_v44, %v716_v50  ;;  %v299_v44 = vld [vmem:[#allocation11 + $0x8] sm:$0xff] }
 0x360   :  { %v721_v52 = vmul.f32 1.442695, %v718_v51 }
 0x361   :  { %v882_v63 = vpop.permute.xlu0 %881 }
 0x362   :  { %5744 = vpow2.f32 %v721_v52 }
 0x36b   :  { %v5743_v53 = vpop.eup %5742 }
 0x36c   :  { %v723_v54 = vsel %vm556_vm4, %v5743_v53, 0.0 }
 0x36d   :  { %724 = vadd.xlane.f32.xlu1 %v723_v54 }
 0x36f   :  { %v5745_v55 = vpop.eup %5744 }
 0x370   :  { %v726_v56 = vsel %vm556_vm4, %v5745_v55, 0.0 }
 0x371   :  { %727 = vadd.xlane.f32.xlu1 %v726_v56 }
 0x382   :  { %957 = vrot.lane.b32.xlu1 %v6286_v35, %s6030_s7 }
 0x3f6   :  { %v725_v59 = vpop.xlane.xlu1 %724 }
 0x3f7   :  { %5746 = vrcp.f32 %v725_v59 }
 0x3fa   :  { %v728_v60 = vpop.xlane.xlu1 %727 }
 0x3fb   :  { %5748 = vrcp.f32 %v728_v60 }
 0x3fe   :  { %v958_v2 = vpop.permute.xlu1 %957 }
 0x404   :  { %v5747_v61 = vpop.eup %5746 }
 0x405   :  { %v730_v62 = vmul.f32 %v5747_v61, %v5743_v53 }
 0x407   :  { %5422 = vmatmul.mubr.msk.f32.vlgmr.msra.gmra.mxu1 %vm556_vm4, %v730_v62 }
 0x408   :  { %v5749_v0 = vpop.eup %5748  ;;  %5430 = vmatpush3.xpose.msk.msra.mxu1 %vm556_vm4, %v882_v63  ;;  %5431 = vmatprep.mubr.msk.f32.mxu1 %vm6029_vm3, %v6028_v23 }
 0x409   :  { %v732_v1 = vmul.f32 %v5749_v0, %v5745_v55  ;;  %5439 = vmatprep.subr.mxu1 %v6028_v23 }
 0x40b   :  { %5427 = vmatmul.mubr.msk.f32.vlgmr.msra.gmra.mxu0 %vm556_vm4, %v732_v1  ;;  %5432 = vmatmul.mubr.msk.f32.vlgmr.msra.gmra.mxu1 %vm556_vm4, %v880_v58 }
 0x40c   :  { %5435 = vmatpush3.xpose.msk.msra.mxu0 %vm556_vm4, %v960_v57  ;;  %5436 = vmatprep.mubr.msk.f32.mxu0 %vm6029_vm3, %v6028_v23 }
 0x40d   :  { %5444 = vmatprep.subr.mxu0 %v6028_v23  ;;  %5441 = vmatprep.mubr.msk.f32.mxu1 %vm6029_vm3, %v6028_v23 }
 0x40f   :  { %5437 = vmatmul.mubr.msk.f32.vlgmr.msra.gmra.mxu0 %vm556_vm4, %v958_v2 }
 0x410   :  { %5446 = vmatprep.mubr.msk.f32.mxu0 %vm6029_vm3, %v6028_v23 }
 0x4c7   :  { %v6325_v3 = vpop.f32.mrf.mxu1 }
 0x4c9   :  { %v5423_v4 = vpop.f32.mrf.mxu1 }
 0x4cb   :  { %v6327_v5 = vpop.f32.mrf.mxu0  ;;  %v953_v6 = vpop.f32.mrf.mxu1 }
 0x4cc   :  { %v1035_v7 = vmul.f32 0.35355338, %v953_v6 }
 0x4cd   :  { %v5428_v8 = vpop.f32.mrf.mxu0  ;;  %v5433_v9 = vpop.f32.mrf.mxu1 }
 0x4ce   :  { %v1037_v10 = vsel %vm556_vm4, %v1035_v7, -inf }
 0x4cf   :  { %1038 = vmax.xlane.f32.xlu0 %v1037_v10  ;;  %v1031_v11 = vpop.f32.mrf.mxu0 }
 0x4d0   :  { %v1036_v12 = vmul.f32 0.35355338, %v1031_v11 }
 0x4d1   :  { %v5438_v13 = vpop.f32.mrf.mxu0 }
 0x4d2   :  { %v1040_v14 = vsel %vm556_vm4, %v1036_v12, -inf }
 0x4d3   :  { %1041 = vmax.xlane.f32.xlu1 %v1040_v14 }
 0x4e4   :  { %1137 = vrot.lane.b32.xlu1 %v6289_v37, %s6030_s7 }
 0x4e8   :  { %1296 = vrot.lane.b32.xlu1 %v6266_v30, %s6031_s3 }
 0x4ec   :  { %1374 = vrot.lane.b32.xlu1 %v6264_v27, %s6031_s3 }
 0x4f0   :  { %1372 = vrot.lane.b32.xlu1 %v6286_v35, %s6031_s3 }
 0x558   :  { %v1039_v15 = vpop.xlane.xlu0 %1038 }
 0x559   :  { %v1043_v16 = vsub.f32 %v1035_v7, %v1039_v15  ;;  %v300_v15 = vld [vmem:[#allocation11 + $0x10] sm:$0xff] }
 0x55b   :  { %v1045_v17 = vmul.f32 1.442695, %v1043_v16 }
 0x55c   :  { %v1042_v20 = vpop.xlane.xlu1 %1041 }
 0x55d   :  { %5750 = vpow2.f32 %v1045_v17  ;;  %v1044_v21 = vsub.f32 %v1036_v12, %v1042_v20 }
 0x55f   :  { %v1047_v22 = vmul.f32 1.442695, %v1044_v21 }
 0x560   :  { %v1138_v24 = vpop.permute.xlu1 %1137 }
 0x561   :  { %5752 = vpow2.f32 %v1047_v22  ;;  %5445 = vmatpush3.msra.mxu0 %v1138_v24 }
 0x562   :  { %5454 = vmatprep.subr.mxu0 %v6028_v23 }
 0x564   :  { %v1297_v42 = vpop.permute.xlu1 %1296 }
 0x568   :  { %v1375_v46 = vpop.permute.xlu1 %1374 }
 0x56a   :  { %v5751_v25 = vpop.eup %5750 }
 0x56b   :  { %v1049_v26 = vsel %vm556_vm4, %v5751_v25, 0.0 }
 0x56c   :  { %1050 = vadd.xlane.f32.xlu0 %v1049_v26  ;;  %v1373_v50 = vpop.permute.xlu1 %1372 }
 0x56e   :  { %v5753_v28 = vpop.eup %5752 }
 0x56f   :  { %v1052_v29 = vsel %vm556_vm4, %v5753_v28, 0.0 }
 0x570   :  { %1053 = vadd.xlane.f32.xlu0 %v1052_v29 }
 0x586   :  { %1060 = vrot.lane.b32.xlu0 %v6291_v38, %s6030_s7 }
 0x58a   :  { %1294 = vrot.lane.b32.xlu0 %v6270_v32, %s6031_s3 }
 0x5f5   :  { %v1051_v31 = vpop.xlane.xlu0 %1050 }
 0x5f6   :  { %5754 = vrcp.f32 %v1051_v31 }
 0x5f9   :  { %v1054_v33 = vpop.xlane.xlu0 %1053 }
 0x5fa   :  { %5756 = vrcp.f32 %v1054_v33 }
 0x5fd   :  { %v1061_v34 = vpop.permute.xlu0 %1060 }
 0x5fe   :  { %5440 = vmatpush3.msra.mxu1 %v1061_v34 }
 0x5ff   :  { %5449 = vmatprep.subr.mxu1 %v299_v44 }
 0x601   :  { %v1295_v43 = vpop.permute.xlu0 %1294 }
 0x603   :  { %v5755_v36 = vpop.eup %5754 }
 0x604   :  { %v1056_v39 = vmul.f32 %v5755_v36, %v5751_v25 }
 0x606   :  { %5442 = vmatmul.mubr.msk.f32.vlgmr.msra.gmra.mxu1 %vm556_vm4, %v1056_v39 }
 0x607   :  { %v5757_v40 = vpop.eup %5756  ;;  %5450 = vmatpush3.msra.mxu1 %v299_v44 }
 0x608   :  { %v1058_v41 = vmul.f32 %v5757_v40, %v5753_v28  ;;  %5459 = vmatprep.subr.mxu1 %v6028_v23 }
 0x60a   :  { %5447 = vmatmul.mubr.msk.f32.vlgmr.msra.gmra.mxu0 %vm556_vm4, %v1058_v41 }
 0x60b   :  { %5455 = vmatpush3.xpose.msk.msra.mxu0 %vm556_vm4, %v1297_v42  ;;  %5456 = vmatprep.mubr.msk.f32.mxu0 %vm6029_vm3, %v6028_v23 }
 0x60c   :  { %5464 = vmatprep.subr.mxu0 %v6028_v23 }
 0x60e   :  { %5457 = vmatmul.mubr.msk.f32.vlgmr.msra.gmra.mxu0 %vm556_vm4, %v1295_v43 }
 0x60f   :  { %5466 = vmatprep.mubr.msk.f32.mxu0 %vm6029_vm3, %v6028_v23 }
 0x6c6   :  { %v1132_v45 = vpop.f32.mrf.mxu1 }
 0x6c7   :  { %5451 = vmatprep.mubr.msk.f32.mxu1 %vm556_vm4, %v1132_v45 }
 0x6c8   :  { %v5443_v47 = vpop.f32.mrf.mxu1 }
 0x6ca   :  { %v1209_v48 = vpop.f32.mrf.mxu0 }
 0x6cb   :  { %5452 = vmatmul.mubr.msk.f32.vlgmr.msra.gmra.mxu1 %vm556_vm4, %v1209_v48 }
 0x6cc   :  { %5460 = vmatpush3.xpose.msk.msra.mxu1 %vm556_vm4, %v1375_v46  ;;  %v5448_v49 = vpop.f32.mrf.mxu0  ;;  %5461 = vmatprep.mubr.msk.f32.mxu1 %vm6029_vm3, %v6028_v23 }
 0x6cd   :  { %5469 = vmatprep.subr.mxu1 %v6028_v23 }
 0x6ce   :  { %v1368_v51 = vpop.f32.mrf.mxu0 }
 0x6cf   :  { %v1450_v52 = vmul.f32 0.35355338, %v1368_v51  ;;  %5462 = vmatmul.mubr.msk.f32.vlgmr.msra.gmra.mxu1 %vm556_vm4, %v1373_v50 }
 0x6d0   :  { %v5458_v53 = vpop.f32.mrf.mxu0  ;;  %5471 = vmatprep.mubr.msk.f32.mxu1 %vm6029_vm3, %v6028_v23 }
 0x6d1   :  { %v1452_v54 = vsel %vm556_vm4, %v1450_v52, -inf }
 0x6d2   :  { %1453 = vmax.xlane.f32.xlu0 %v1452_v54 }
 0x75b   :  { %v1454_v55 = vpop.xlane.xlu0 %1453 }
 0x75c   :  { %v1458_v56 = vsub.f32 %v1450_v52, %v1454_v55  ;;  %v298_v52 = vld [vmem:[#allocation11] sm:$0xff] }
 0x75e   :  { %v1460_v57 = vmul.f32 1.442695, %v1458_v56 }
 0x760   :  { %5758 = vpow2.f32 %v1460_v57 }
 0x76d   :  { %v5759_v58 = vpop.eup %5758 }
 0x76e   :  { %v1464_v59 = vsel %vm556_vm4, %v5759_v58, 0.0 }
 0x76f   :  { %1465 = vadd.xlane.f32.xlu0 %v1464_v59 }
 0x78b   :  { %v6367_v60 = vpop.f32.mrf.mxu1 }
 0x78d   :  { %v6369_v61 = vpop.f32.mrf.mxu1 }
 0x78f   :  { %v1446_v62 = vpop.f32.mrf.mxu1 }
 0x790   :  { %v1451_v63 = vmul.f32 0.35355338, %v1446_v62 }
 0x791   :  { %v5463_v0 = vpop.f32.mrf.mxu1 }
 0x792   :  { %v1455_v1 = vsel %vm556_vm4, %v1451_v63, -inf }
 0x793   :  { %1456 = vmax.xlane.f32.xlu1 %v1455_v1 }
 0x7a4   :  { %1550 = vrot.lane.b32.xlu1 %v6289_v37, %s6031_s3 }
 0x7a8   :  { %1709 = vrot.lane.b32.xlu1 %v6266_v30, %s6032_s28 }
 0x7ac   :  { %1787 = vrot.lane.b32.xlu1 %v6264_v27, %s6032_s28 }
 0x7b0   :  { %1785 = vrot.lane.b32.xlu1 %v6286_v35, %s6032_s28 }
 0x7f8   :  { %v1466_v27 = vpop.xlane.xlu0 %1465 }
 0x81c   :  { %v1457_v2 = vpop.xlane.xlu1 %1456 }
 0x81d   :  { %v1459_v4 = vsub.f32 %v1451_v63, %v1457_v2 }
 0x81f   :  { %v1462_v6 = vmul.f32 1.442695, %v1459_v4 }
 0x820   :  { %v1551_v7 = vpop.permute.xlu1 %1550 }
 0x821   :  { %5760 = vpow2.f32 %v1462_v6  ;;  %5470 = vmatpush3.msra.mxu1 %v1551_v7 }
 0x822   :  { %5479 = vmatprep.subr.mxu1 %v6028_v23  ;;  %5762 = vrcp.f32 %v1466_v27 }
 0x824   :  { %v1710_v14 = vpop.permute.xlu1 %1709 }
 0x828   :  { %v1788_v20 = vpop.permute.xlu1 %1787 }
 0x82c   :  { %v1786_v24 = vpop.permute.xlu1 %1785 }
 0x82e   :  { %v5761_v8 = vpop.eup %5760 }
 0x82f   :  { %v1467_v9 = vsel %vm556_vm4, %v5761_v8, 0.0  ;;  %v5763_v35 = vpop.eup %5762 }
 0x830   :  { %1468 = vadd.xlane.f32.xlu0 %v1467_v9  ;;  %v1471_v11 = vmul.f32 %v5763_v35, %v5759_v58 }
 0x846   :  { %1474 = vrot.lane.b32.xlu0 %v6291_v38, %s6031_s3 }
 0x84a   :  { %1707 = vrot.lane.b32.xlu0 %v6270_v32, %s6032_s28 }
 0x8b9   :  { %v1469_v30 = vpop.xlane.xlu0 %1468 }
 0x8ba   :  { %5764 = vrcp.f32 %v1469_v30 }
 0x8bd   :  { %v1475_v10 = vpop.permute.xlu0 %1474 }
 0x8be   :  { %5465 = vmatpush3.msra.mxu0 %v1475_v10 }
 0x8bf   :  { %5467 = vmatmul.mubr.msk.f32.vlgmr.msra.gmra.mxu0 %vm556_vm4, %v1471_v11  ;;  %5474 = vmatprep.subr.mxu0 %v300_v15 }
 0x8c0   :  { %5475 = vmatpush3.msra.mxu0 %v300_v15 }
 0x8c1   :  { %v1708_v32 = vpop.permute.xlu0 %1707  ;;  %5484 = vmatprep.subr.mxu0 %v6028_v23 }
 0x8c7   :  { %v5765_v12 = vpop.eup %5764 }
 0x8c8   :  { %v1473_v13 = vmul.f32 %v5765_v12, %v5761_v8 }
 0x8ca   :  { %5472 = vmatmul.mubr.msk.f32.vlgmr.msra.gmra.mxu1 %vm556_vm4, %v1473_v13 }
 0x8cb   :  { %5480 = vmatpush3.xpose.msk.msra.mxu1 %vm556_vm4, %v1710_v14  ;;  %5481 = vmatprep.mubr.msk.f32.mxu1 %vm6029_vm3, %v6028_v23 }
 0x8cc   :  { %5489 = vmatprep.subr.mxu1 %v6028_v23 }
 0x8ce   :  { %5482 = vmatmul.mubr.msk.f32.vlgmr.msra.gmra.mxu1 %vm556_vm4, %v1708_v32 }
 0x8cf   :  { %5491 = vmatprep.mubr.msk.f32.mxu1 %vm6029_vm3, %v6028_v23 }
 0x97f   :  { %v1546_v16 = vpop.f32.mrf.mxu0 }
 0x980   :  { %5476 = vmatprep.mubr.msk.f32.mxu0 %vm556_vm4, %v1546_v16 }
 0x981   :  { %v5468_v17 = vpop.f32.mrf.mxu0 }
 0x98a   :  { %v1622_v21 = vpop.f32.mrf.mxu1 }
 0x98b   :  { %5477 = vmatmul.mubr.msk.f32.vlgmr.msra.gmra.mxu0 %vm556_vm4, %v1622_v21 }
 0x98c   :  { %5485 = vmatpush3.xpose.msk.msra.mxu0 %vm556_vm4, %v1788_v20  ;;  %v5473_v22 = vpop.f32.mrf.mxu1  ;;  %5486 = vmatprep.mubr.msk.f32.mxu0 %vm6029_vm3, %v6028_v23 }
 0x98d   :  { %5494 = vmatprep.subr.mxu0 %v6028_v23 }
 0x98e   :  { %v1781_v25 = vpop.f32.mrf.mxu1 }
 0x98f   :  { %v1863_v26 = vmul.f32 0.35355338, %v1781_v25  ;;  %5487 = vmatmul.mubr.msk.f32.vlgmr.msra.gmra.mxu0 %vm556_vm4, %v1786_v24  ;;  %v2263_v24 = vld [vmem:[#allocation13 + $0x18] sm:$0xff]  ;;  %v2261_v25 = vld [vmem:[#allocation13 + $0x8] sm:$0xff] }
 0x990   :  { %v5483_v28 = vpop.f32.mrf.mxu1  ;;  %5496 = vmatprep.mubr.msk.f32.mxu0 %vm6029_vm3, %v6028_v23 }
 0x991   :  { %v1865_v29 = vsel %vm556_vm4, %v1863_v26, -inf }
 0x992   :  { %1866 = vmax.xlane.f32.xlu0 %v1865_v29 }
 0xa1b   :  { %v1867_v31 = vpop.xlane.xlu0 %1866 }
 0xa1c   :  { %v1871_v33 = vsub.f32 %v1863_v26, %v1867_v31  ;;  %v2260_v26 = vld [vmem:[#allocation13] sm:$0xff] }
 0xa1e   :  { %v1873_v34 = vmul.f32 1.442695, %v1871_v33 }
 0xa20   :  { %5766 = vpow2.f32 %v1873_v34 }
 0xa2d   :  { %v5767_v36 = vpop.eup %5766 }
 0xa2e   :  { %v1877_v39 = vsel %vm556_vm4, %v5767_v36, 0.0 }
 0xa2f   :  { %1878 = vadd.xlane.f32.xlu0 %v1877_v39 }
 0xa4b   :  { %v5478_v40 = vpop.f32.mrf.mxu0 }
 0xa4d   :  { %v1698_v41 = vpop.f32.mrf.mxu0 }
 0xa4f   :  { %v1859_v42 = vpop.f32.mrf.mxu0 }
 0xa50   :  { %v1864_v43 = vmul.f32 0.35355338, %v1859_v42 }
 0xa51   :  { %v5488_v44 = vpop.f32.mrf.mxu0 }
 0xa52   :  { %v1868_v45 = vsel %vm556_vm4, %v1864_v43, -inf }
 0xa53   :  { %1869 = vmax.xlane.f32.xlu1 %v1868_v45  ;;  %v5117_v45 = vld [vmem:[%s6803_s17] ss:$0 sm:$0xff] }
 0xa64   :  { %1963 = vrot.lane.b32.xlu1 %v6289_v37, %s6032_s28 }
 0xab8   :  { %v1879_v53 = vpop.xlane.xlu0 %1878 }
 0xadc   :  { %v1870_v46 = vpop.xlane.xlu1 %1869 }
 0xadd   :  { %v1872_v47 = vsub.f32 %v1864_v43, %v1870_v46 }
 0xadf   :  { %v1875_v48 = vmul.f32 1.442695, %v1872_v47 }
 0xae0   :  { %v1964_v49 = vpop.permute.xlu1 %1963 }
 0xae1   :  { %5768 = vpow2.f32 %v1875_v48  ;;  %5495 = vmatpush3.msra.mxu0 %v1964_v49  ;;  %v2357_v49 = vld [vmem:[#allocation14 + $0x18] sm:$0xff] }
 0xae2   :  { %5504 = vmatprep.subr.mxu0 %v298_v52  ;;  %5770 = vrcp.f32 %v1879_v53  ;;  %v5118_v53 = vld [vmem:[%s6799_s13] ss:$0 sm:$0xff] }
 0xaee   :  { %v5769_v50 = vpop.eup %5768 }
 0xaef   :  { %v1880_v51 = vsel %vm556_vm4, %v5769_v50, 0.0  ;;  %v5771_v55 = vpop.eup %5770 }
 0xaf0   :  { %1881 = vadd.xlane.f32.xlu0 %v1880_v51  ;;  %v1884_v56 = vmul.f32 %v5771_v55, %v5767_v36  ;;  %v2355_v51 = vld [vmem:[#allocation14 + $0x8] sm:$0xff] }
 0xb06   :  { %1887 = vrot.lane.b32.xlu0 %v6291_v38, %s6032_s28  ;;  %v301_v38 = vld [vmem:[#allocation11 + $0x18] sm:$0xff] }
 0xb79   :  { %v1882_v54 = vpop.xlane.xlu0 %1881 }
 0xb7a   :  { %5772 = vrcp.f32 %v1882_v54 }
 0xb7d   :  { %v1888_v37 = vpop.permute.xlu0 %1887 }
 0xb7e   :  { %5490 = vmatpush3.msra.mxu1 %v1888_v37 }
 0xb7f   :  { %5492 = vmatmul.mubr.msk.f32.vlgmr.msra.gmra.mxu1 %vm556_vm4, %v1884_v56  ;;  %5499 = vmatprep.subr.mxu1 %v301_v38 }
 0xb80   :  { %5500 = vmatpush3.msra.mxu1 %v301_v38  ;;  %v5121_v38 = vld [vmem:[%s6801_s15] ss:$0 sm:$0xff] }
 0xb81   :  { %5509 = vmatprep.subr.mxu1 %v2263_v24 }
 0xb87   :  { %v5773_v57 = vpop.eup %5772 }
 0xb88   :  { %v1886_v58 = vmul.f32 %v5773_v57, %v5769_v50  ;;  %v2356_v50 = vld [vmem:[#allocation14 + $0x10] sm:$0xff] }
 0xb8a   :  { %5497 = vmatmul.mubr.msk.f32.vlgmr.msra.gmra.mxu0 %vm556_vm4, %v1886_v58 }
 0xb8b   :  { %5506 = vmatprep.mubr.msk.f32.mxu0 %vm556_vm4, %v6325_v3  ;;  %5505 = vmatpush3.msra.mxu0 %v298_v52  ;;  %v2354_v52 = vld [vmem:[#allocation14] sm:$0xff] }
 0xb8c   :  { %5520 = vmatprep.subr.mxu0 %v2357_v49 }
 0xb8e   :  { %5507 = vmatmul.mubr.msk.f32.vlgmr.msra.gmra.mxu0 %vm556_vm4, %v6327_v5  ;;  %v5115_v5 = vld [vmem:[%s6797_s11] ss:$0 sm:$0xff] }
 0xb8f   :  { %5521 = vmatpush3.msra.mxu0 %v2357_v49 }
 0xb90   :  { %5522 = vmatprep.subr.mxu0 %v2356_v50 }
 0xb91   :  { %5523 = vmatpush3.msra.mxu0 %v2356_v50  ;;  %v5137_v50 = vld [vmem:[#allocation8 + $0x1] ss:$0 sm:$0xff] }
 0xb92   :  { %5524 = vmatprep.subr.mxu0 %v2355_v51 }
 0xb93   :  { %5525 = vmatpush3.msra.mxu0 %v2355_v51 }
 0xb94   :  { %5526 = vmatprep.subr.mxu0 %v2354_v52 }
 0xb95   :  { %5527 = vmatpush3.msra.mxu0 %v2354_v52 }
 0xc3f   :  { %v1959_v59 = vpop.f32.mrf.mxu1 }
 0xc40   :  { %5501 = vmatprep.mubr.msk.f32.mxu1 %vm556_vm4, %v1959_v59 }
 0xc41   :  { %v5493_v62 = vpop.f32.mrf.mxu1 }
 0xc4a   :  { %v2035_v63 = vpop.f32.mrf.mxu0 }
 0xc4b   :  { %5502 = vmatmul.mubr.msk.f32.vlgmr.msra.gmra.mxu1 %vm556_vm4, %v2035_v63 }
 0xc4c   :  { %v5498_v0 = vpop.f32.mrf.mxu0  ;;  %5510 = vmatpush3.msra.mxu1 %v2263_v24 }
 0xc4e   :  { %v5508_v1 = vpop.f32.mrf.mxu0 }
 0xc4f   :  { %v2198_v4 = vadd.f32 %v5508_v1, %v6367_v60 }
 0xc50   :  { %v2192_v2 = vpop.f32.mrf.mxu0 }
 0xc51   :  { %v2193_v3 = vadd.f32 %v2192_v2, %v6369_v61  ;;  %v2202_v6 = vadd.f32 %v5478_v40, %v2198_v4  ;;  %v5116_v40 = vld [vmem:[%s6802_s16] ss:$0 sm:$0xff] }
 0xc53   :  { %v2201_v9 = vadd.f32 %v2193_v3, %v1698_v41 }
 0xd0b   :  { %v5503_v7 = vpop.f32.mrf.mxu1 }
 0xd0c   :  { %v2204_v8 = vadd.f32 %v5503_v7, %v2202_v6 }
 0xd0d   :  { %v2111_v27 = vpop.f32.mrf.mxu1 }
 0xd0e   :  { %v2212_v30 = vadd.f32 %v5115_v5, %v2204_v8  ;;  %v2203_v35 = vadd.f32 %v2201_v9, %v2111_v27 }
 0xd10   :  { %v2211_v10 = vadd.f32 %v5115_v5, %v2203_v35  ;;  %v2214_v11 = vadd.f32 %v2212_v30, %v6241_v19 }
 0xd12   :  { %v2220_v12 = vsel %vm312_vm2, %v2214_v11, 0.0  ;;  %v2213_v60 = vadd.f32 %v2211_v10, %v6239_v18  ;;  %v2262_v18 = vld [vmem:[#allocation13 + $0x10] sm:$0xff] }
 0xd13   :  { %2221 = vadd.xlane.f32.xlu0 %v2220_v12  ;;  %5511 = vmatprep.subr.mxu1 %v2262_v18  ;;  %v5129_v12 = vld [vmem:[%s6837_s29 + $0x38] sm:$0xff] }
 0xd14   :  { %v2217_v61 = vsel %vm312_vm2, %v2213_v60, 0.0  ;;  %5512 = vmatpush3.msra.mxu1 %v2262_v18 }
 0xd15   :  { %2218 = vadd.xlane.f32.xlu1 %v2217_v61  ;;  %5513 = vmatprep.subr.mxu1 %v2261_v25  ;;  %v5128_v61 = vld [vmem:[%s6837_s29 + $0x30] sm:$0xff] }
 0xd16   :  { %5514 = vmatpush3.msra.mxu1 %v2261_v25 }
 0xd17   :  { %5515 = vmatprep.subr.mxu1 %v2260_v26 }
 0xd18   :  { %5516 = vmatpush3.msra.mxu1 %v2260_v26  ;;  %v5124_v26 = vld [vmem:[%s6804_s18] ss:$0 sm:$0xff] }
 0xd19   :  { %5531 = vmatprep.subr.mxu1 %v5129_v12 }
 0xd9c   :  { %v2222_v13 = vpop.xlane.xlu0 %2221 }
 0xd9d   :  { %v2225_v14 = vmul.f32 0.03125, %v2222_v13  ;;  %v5132_v13 = vld [vmem:[%s6838_s6 + $0x30] sm:$0xff] }
 0xd9e   :  { %v2219_v32 = vpop.xlane.xlu1 %2218 }
 0xd9f   :  { %v2227_v15 = vsub.f32 %v2214_v11, %v2225_v14  ;;  %v2224_v16 = vmul.f32 0.03125, %v2219_v32  ;;  %v5127_v14 = vld [vmem:[%s6837_s29 + $0x28] sm:$0xff] }
 0xda0   :  { %v5131_v32 = vld [vmem:[%s6838_s6 + $0x28] sm:$0xff] }
 0xda1   :  { %v2226_v17 = vsub.f32 %v2213_v60, %v2224_v16  ;;  %v2229_v20 = vmul.f32 %v2227_v15, %v2227_v15  ;;  %v5133_v60 = vld [vmem:[%s6838_s6 + $0x38] sm:$0xff]  ;;  %v5130_v16 = vld [vmem:[%s6838_s6 + $0x20] sm:$0xff] }
 0xda2   :  { %5542 = vmatprep.subr.mxu0 %v5133_v60 }
 0xda3   :  { %v2233_v21 = vsel %vm312_vm2, %v2229_v20, 0.0  ;;  %v2228_v22 = vmul.f32 %v2226_v17, %v2226_v17 }
 0xda4   :  { %2234 = vadd.xlane.f32.xlu1 %v2233_v21 }
 0xda5   :  { %v2230_v19 = vsel %vm312_vm2, %v2228_v22, 0.0 }
 0xda6   :  { %2231 = vadd.xlane.f32.xlu0 %v2230_v19 }
 0xe2d   :  { %v2235_v28 = vpop.xlane.xlu1 %2234 }
 0xe2e   :  { %v2237_v29 = vmul.f32 0.03125, %v2235_v28 }
 0xe2f   :  { %v2232_v31 = vpop.xlane.xlu0 %2231 }
 0xe30   :  { %v2239_v33 = vadd.f32 1e-05, %v2237_v29  ;;  %v2236_v34 = vmul.f32 0.03125, %v2232_v31 }
 0xe32   :  { %5774 = vrsqrt.f32 %v2239_v33  ;;  %v2238_v36 = vadd.f32 1e-05, %v2236_v34  ;;  %v5125_v34 = vld [vmem:[%s6805_s19] ss:$0 sm:$0xff] }
 0xe34   :  { %5776 = vrsqrt.f32 %v2238_v36 }
 0xe3f   :  { %v5775_v39 = vpop.eup %5774 }
 0xe40   :  { %v2243_v41 = vmul.f32 %v5775_v39, %v2227_v15  ;;  %v5126_v15 = vld [vmem:[%s6837_s29 + $0x20] sm:$0xff] }
 0xe41   :  { %v5777_v42 = vpop.eup %5776 }
 0xe42   :  { %v2242_v43 = vmul.f32 %v5777_v42, %v2226_v17  ;;  %v2251_v44 = vmul.f32 %v5116_v40, %v2243_v41  ;;  %v2506_v17 = vld [vmem:[#allocation10 + $0x38] sm:$0xff]  ;;  %v2505_v41 = vld [vmem:[#allocation10 + $0x30] sm:$0xff]  ;;  %v2504_v42 = vld [vmem:[#allocation10 + $0x28] sm:$0xff] }
 0xe44   :  { %v2250_v46 = vmul.f32 %v5116_v40, %v2242_v43  ;;  %v2259_v48 = vadd.f32 %v5117_v45, %v2251_v44  ;;  %v2503_v43 = vld [vmem:[#allocation10 + $0x20] sm:$0xff] }
 0xe46   :  { %v2258_v47 = vadd.f32 %v5117_v45, %v2250_v46  ;;  %v5140_v46 = vld [vmem:[%s6839_s10 + $0x1] ss:$0 sm:$0xff] }
 0xe48   :  { %5517 = vmatprep.mubr.msk.f32.mxu1 %vm312_vm2, %v2258_v47 }
 0xe49   :  { %5518 = vmatmul.mubr.msk.f32.vlgmr.msra.gmra.mxu1 %vm312_vm2, %v2259_v48 }
 0xe4a   :  { %5532 = vmatpush3.msra.mxu1 %v5129_v12 }
 0xe4b   :  { %5533 = vmatprep.subr.mxu1 %v5128_v61 }
 0xe4c   :  { %5534 = vmatpush3.msra.mxu1 %v5128_v61 }
 0xe4d   :  { %5535 = vmatprep.subr.mxu1 %v5127_v14 }
 0xe4e   :  { %5536 = vmatpush3.msra.mxu1 %v5127_v14 }
 0xe4f   :  { %5537 = vmatprep.subr.mxu1 %v5126_v15 }
 0xe50   :  { %5538 = vmatpush3.msra.mxu1 %v5126_v15 }
 0xe51   :  { %5553 = vmatprep.subr.mxu1 %v2506_v17 }
 0xf09   :  { %v5519_v54 = vpop.f32.mrf.mxu1 }
 0xf0a   :  { %v2349_v55 = vadd.f32 %v5519_v54, %v5118_v53  ;;  %v5143_v54 = vld [vmem:[%s6840_s0 + $0x1] ss:$0 sm:$0xff] }
 0xf0b   :  { %v2343_v37 = vpop.f32.mrf.mxu1 }
 0xf0c   :  { %v2344_v56 = vadd.f32 %v5118_v53, %v2343_v37  ;;  %v2353_v58 = vmax.f32 %v2349_v55, 0.0 }
 0xf0e   :  { %v2352_v57 = vmax.f32 %v2344_v56, 0.0 }
 0xf10   :  { %5528 = vmatprep.mubr.msk.f32.mxu0 %vm312_vm2, %v2352_v57 }
 0xf11   :  { %5529 = vmatmul.mubr.msk.f32.vlgmr.msra.gmra.mxu0 %vm312_vm2, %v2353_v58 }
 0xf12   :  { %5543 = vmatpush3.msra.mxu0 %v5133_v60 }
 0xf13   :  { %5544 = vmatprep.subr.mxu0 %v5132_v13 }
 0xf14   :  { %5545 = vmatpush3.msra.mxu0 %v5132_v13 }
 0xf15   :  { %5546 = vmatprep.subr.mxu0 %v5131_v32 }
 0xf16   :  { %5547 = vmatpush3.msra.mxu0 %v5131_v32 }
 0xf17   :  { %5548 = vmatprep.subr.mxu0 %v5130_v16 }
 0xf18   :  { %5549 = vmatpush3.msra.mxu0 %v5130_v16 }
 0xf19   :  { %5564 = vmatprep.subr.mxu0 %v6028_v23 }
 0xfd1   :  { %v5530_v59 = vpop.f32.mrf.mxu0 }
 0xfd2   :  { %v2443_v62 = vadd.f32 %v5530_v59, %v5121_v38 }
 0xfd3   :  { %v2437_v63 = vpop.f32.mrf.mxu0 }
 0xfd4   :  { %v2438_v0 = vadd.f32 %v5121_v38, %v2437_v63  ;;  %v2447_v1 = vadd.f32 %v2443_v62, %v2259_v48 }
 0xfd6   :  { %v2453_v2 = vsel %vm312_vm2, %v2447_v1, 0.0  ;;  %v2446_v4 = vadd.f32 %v2438_v0, %v2258_v47 }
 0xfd7   :  { %2454 = vadd.xlane.f32.xlu1 %v2453_v2 }
 0xfd8   :  { %v2450_v3 = vsel %vm312_vm2, %v2446_v4, 0.0 }
 0xfd9   :  { %2451 = vadd.xlane.f32.xlu0 %v2450_v3 }
0x1060   :  { %v2455_v6 = vpop.xlane.xlu1 %2454 }
0x1061   :  { %v2457_v5 = vmul.f32 0.03125, %v2455_v6 }
0x1062   :  { %v2452_v7 = vpop.xlane.xlu0 %2451 }
0x1063   :  { %v2459_v8 = vsub.f32 %v2447_v1, %v2457_v5  ;;  %v2456_v9 = vmul.f32 0.03125, %v2452_v7 }
0x1065   :  { %v2458_v27 = vsub.f32 %v2446_v4, %v2456_v9  ;;  %v2461_v30 = vmul.f32 %v2459_v8, %v2459_v8 }
0x1067   :  { %v2465_v35 = vsel %vm312_vm2, %v2461_v30, 0.0  ;;  %v2460_v10 = vmul.f32 %v2458_v27, %v2458_v27 }
0x1068   :  { %2466 = vadd.xlane.f32.xlu1 %v2465_v35 }
0x1069   :  { %v2462_v11 = vsel %vm312_vm2, %v2460_v10, 0.0 }
0x106a   :  { %2463 = vadd.xlane.f32.xlu0 %v2462_v11 }
0x10f1   :  { %v2467_v20 = vpop.xlane.xlu1 %2466 }
0x10f2   :  { %v2469_v21 = vmul.f32 0.03125, %v2467_v20 }
0x10f3   :  { %v2464_v22 = vpop.xlane.xlu0 %2463 }
0x10f4   :  { %v2471_v19 = vadd.f32 1e-05, %v2469_v21  ;;  %v2468_v24 = vmul.f32 0.03125, %v2464_v22 }
0x10f6   :  { %5778 = vrsqrt.f32 %v2471_v19  ;;  %v2470_v18 = vadd.f32 1e-05, %v2468_v24 }
0x10f8   :  { %5780 = vrsqrt.f32 %v2470_v18 }
0x1103   :  { %v5779_v25 = vpop.eup %5778 }
0x1104   :  { %v2475_v28 = vmul.f32 %v5779_v25, %v2459_v8 }
0x1105   :  { %v5781_v29 = vpop.eup %5780 }
0x1106   :  { %v2474_v31 = vmul.f32 %v5781_v29, %v2458_v27  ;;  %v2483_v33 = vmul.f32 %v5124_v26, %v2475_v28 }
0x1108   :  { %v2482_v36 = vmul.f32 %v5124_v26, %v2474_v31  ;;  %v6485_v40 = vadd.f32 %v5125_v34, %v2483_v33 }
0x110a   :  { %v6483_v39 = vadd.f32 %v5125_v34, %v2482_v36 }
0x110c   :  { %5539 = vmatprep.mubr.msk.f32.mxu1 %vm312_vm2, %v6483_v39  ;;  %5550 = vmatprep.mubr.msk.f32.mxu0 %vm312_vm2, %v6483_v39 }
0x110d   :  { %5540 = vmatmul.mubr.msk.f32.vlgmr.msra.gmra.mxu1 %vm312_vm2, %v6485_v40  ;;  %5551 = vmatmul.mubr.msk.f32.vlgmr.msra.gmra.mxu0 %vm312_vm2, %v6485_v40 }
0x110e   :  { %5554 = vmatpush3.msra.mxu1 %v2506_v17  ;;  %5561 = vmatprep.mubr.msk.f32.mxu1 %vm312_vm2, %v6483_v39 }
0x110f   :  { %5555 = vmatprep.subr.mxu1 %v2505_v41  ;;  %5566 = vmatprep.mubr.msk.f32.mxu0 %vm6029_vm3, %v6028_v23 }
0x1110   :  { %5556 = vmatpush3.msra.mxu1 %v2505_v41 }
0x1111   :  { %5557 = vmatprep.subr.mxu1 %v2504_v42 }
0x1112   :  { %5558 = vmatpush3.msra.mxu1 %v2504_v42 }
0x1113   :  { %5559 = vmatprep.subr.mxu1 %v2503_v43 }
0x1114   :  { %5560 = vmatpush3.msra.mxu1 %v2503_v43 }
0x1115   :  { %5562 = vmatmul.mubr.msk.f32.vlgmr.msra.gmra.mxu1 %vm312_vm2, %v6485_v40  ;;  %5574 = vmatprep.subr.mxu1 %v6028_v23 }
0x1116   :  { %5576 = vmatprep.mubr.msk.f32.mxu1 %vm6029_vm3, %v6028_v23 }
0x11cd   :  { %v5541_v44 = vpop.f32.mrf.mxu1  ;;  %v5552_v45 = vpop.f32.mrf.mxu0 }
0x11ce   :  { %v6514_v52 = vadd.f32 %v5552_v45, %v5140_v46  ;;  %v6525_v55 = vadd.f32 %v5541_v44, %v5137_v50 }
0x11cf   :  { %v2679_v47 = vpop.f32.mrf.mxu0  ;;  %v2598_v48 = vpop.f32.mrf.mxu1 }
0x11d0   :  { %v6507_v49 = vadd.f32 %v5140_v46, %v2679_v47  ;;  %v6511_v51 = vadd.f32 %v5137_v50, %v2598_v48 }
0x11d2   :  { %5565 = vmatpush3.xpose.msk.msra.mxu0 %vm556_vm4, %v6507_v49 }
0x11d3   :  { %5569 = vmatprep.subr.mxu0 %v6028_v23 }
0x11d5   :  { %v5563_v53 = vpop.f32.mrf.mxu1  ;;  %5567 = vmatmul.mubr.msk.f32.vlgmr.msra.gmra.mxu0 %vm556_vm4, %v6511_v51 }
0x11d6   :  { %5570 = vmatpush3.xpose.msk.msra.mxu0 %vm556_vm4, %v6514_v52  ;;  %5571 = vmatprep.mubr.msk.f32.mxu0 %vm6029_vm3, %v6028_v23  ;;  %v6528_v56 = vadd.f32 %v5563_v53, %v5143_v54 }
0x11d7   :  { %v2760_v37 = vpop.f32.mrf.mxu1  ;;  %5579 = vmatprep.subr.mxu0 %v6028_v23 }
0x11d8   :  { %v6530_v57 = vadd.f32 %v5143_v54, %v2760_v37 }
0x11d9   :  { %5572 = vmatmul.mubr.msk.f32.vlgmr.msra.gmra.mxu0 %vm556_vm4, %v6525_v55 }
0x11da   :  { %5575 = vmatpush3.msra.mxu1 %v6530_v57  ;;  %5580 = vmatpush3.msra.mxu0 %v6528_v56 }
0x11db   :  { %5584 = vmatprep.subr.mxu1 %v6028_v23  ;;  %5581 = vmatprep.mubr.msk.f32.mxu0 %vm6029_vm3, %v6028_v23 }
0x11dc   :  { %5589 = vmatprep.subr.mxu0 %v6028_v23 }
0x1295   :  { %v2841_v58 = vpop.f32.mrf.mxu0 }
0x1296   :  { %v2921_v38 = vmul.f32 0.35355338, %v2841_v58 }
0x1297   :  { %v5568_v59 = vpop.f32.mrf.mxu0 }
0x1298   :  { %v2923_v62 = vsel %vm556_vm4, %v2921_v38, -inf }
0x1299   :  { %2924 = vmax.xlane.f32.xlu0 %v2923_v62  ;;  %v2917_v63 = vpop.f32.mrf.mxu0 }
0x129a   :  { %v2922_v0 = vmul.f32 0.35355338, %v2917_v63 }
0x129b   :  { %v5573_v1 = vpop.f32.mrf.mxu0 }
0x129c   :  { %v2926_v2 = vsel %vm556_vm4, %v2922_v0, -inf }
0x129d   :  { %2927 = vmax.xlane.f32.xlu1 %v2926_v2 }
0x12ae   :  { %3171 = vrot.lane.b32.xlu1 %v6514_v52, %s6030_s7 }
0x12b2   :  { %3091 = vrot.lane.b32.xlu1 %v6511_v51, %s6030_s7 }
0x1322   :  { %v2925_v4 = vpop.xlane.xlu0 %2924 }
0x1323   :  { %v2929_v3 = vsub.f32 %v2921_v38, %v2925_v4 }
0x1325   :  { %v2931_v6 = vmul.f32 1.442695, %v2929_v3 }
0x1326   :  { %v2928_v5 = vpop.xlane.xlu1 %2927 }
0x1327   :  { %5782 = vpow2.f32 %v2931_v6  ;;  %v2930_v7 = vsub.f32 %v2922_v0, %v2928_v5  ;;  %v2509_v0 = vld [vmem:[#allocation11 + $0x28] sm:$0xff] }
0x1329   :  { %v2933_v8 = vmul.f32 1.442695, %v2930_v7 }
0x132a   :  { %v3172_v10 = vpop.permute.xlu1 %3171 }
0x132b   :  { %5784 = vpow2.f32 %v2933_v8 }
0x132e   :  { %v3092_v11 = vpop.permute.xlu1 %3091 }
0x1334   :  { %v5783_v9 = vpop.eup %5782 }
0x1335   :  { %v2935_v27 = vsel %vm556_vm4, %v5783_v9, 0.0 }
0x1336   :  { %2936 = vadd.xlane.f32.xlu0 %v2935_v27 }
0x1338   :  { %v5785_v30 = vpop.eup %5784 }
0x1339   :  { %v2938_v35 = vsel %vm556_vm4, %v5785_v30, 0.0 }
0x133a   :  { %2939 = vadd.xlane.f32.xlu1 %v2938_v35 }
0x134b   :  { %3169 = vrot.lane.b32.xlu1 %v6525_v55, %s6030_s7 }
0x134c   :  { %3093 = vrot.lane.b32.xlu0 %v6507_v49, %s6030_s7 }
0x13bf   :  { %v2937_v12 = vpop.xlane.xlu0 %2936 }
0x13c0   :  { %5786 = vrcp.f32 %v2937_v12 }
0x13c3   :  { %v2940_v60 = vpop.xlane.xlu1 %2939  ;;  %v3094_v14 = vpop.permute.xlu0 %3093 }
0x13c4   :  { %5788 = vrcp.f32 %v2940_v60 }
0x13c7   :  { %v3170_v16 = vpop.permute.xlu1 %3169 }
0x13cd   :  { %v5787_v61 = vpop.eup %5786 }
0x13ce   :  { %v2942_v13 = vmul.f32 %v5787_v61, %v5783_v9 }
0x13d0   :  { %5577 = vmatmul.mubr.msk.f32.vlgmr.msra.gmra.mxu1 %vm556_vm4, %v2942_v13 }
0x13d1   :  { %v5789_v32 = vpop.eup %5788  ;;  %5585 = vmatpush3.xpose.msk.msra.mxu1 %vm556_vm4, %v3094_v14  ;;  %5586 = vmatprep.mubr.msk.f32.mxu1 %vm6029_vm3, %v6028_v23 }
0x13d2   :  { %v2944_v15 = vmul.f32 %v5789_v32, %v5785_v30  ;;  %5594 = vmatprep.subr.mxu1 %v6028_v23 }
0x13d4   :  { %5582 = vmatmul.mubr.msk.f32.vlgmr.msra.gmra.mxu0 %vm556_vm4, %v2944_v15  ;;  %5587 = vmatmul.mubr.msk.f32.vlgmr.msra.gmra.mxu1 %vm556_vm4, %v3092_v11 }
0x13d5   :  { %5590 = vmatpush3.xpose.msk.msra.mxu0 %vm556_vm4, %v3172_v10  ;;  %5591 = vmatprep.mubr.msk.f32.mxu0 %vm6029_vm3, %v6028_v23 }
0x13d6   :  { %5599 = vmatprep.subr.mxu0 %v6028_v23  ;;  %5596 = vmatprep.mubr.msk.f32.mxu1 %vm6029_vm3, %v6028_v23 }
0x13d8   :  { %5592 = vmatmul.mubr.msk.f32.vlgmr.msra.gmra.mxu0 %vm556_vm4, %v3170_v16 }
0x13d9   :  { %5601 = vmatprep.mubr.msk.f32.mxu0 %vm6029_vm3, %v6028_v23 }
0x1490   :  { %v6568_v17 = vpop.f32.mrf.mxu1 }
0x1492   :  { %v5578_v20 = vpop.f32.mrf.mxu1 }
0x1494   :  { %v6570_v21 = vpop.f32.mrf.mxu0  ;;  %v3165_v22 = vpop.f32.mrf.mxu1 }
0x1495   :  { %v3247_v19 = vmul.f32 0.35355338, %v3165_v22 }
0x1496   :  { %v5583_v24 = vpop.f32.mrf.mxu0  ;;  %v5588_v18 = vpop.f32.mrf.mxu1 }
0x1497   :  { %v3249_v25 = vsel %vm556_vm4, %v3247_v19, -inf }
0x1498   :  { %3250 = vmax.xlane.f32.xlu0 %v3249_v25  ;;  %v3243_v26 = vpop.f32.mrf.mxu0 }
0x1499   :  { %v3248_v28 = vmul.f32 0.35355338, %v3243_v26 }
0x149a   :  { %v5593_v29 = vpop.f32.mrf.mxu0 }
0x149b   :  { %v3252_v31 = vsel %vm556_vm4, %v3248_v28, -inf }
0x149c   :  { %3253 = vmax.xlane.f32.xlu1 %v3252_v31 }
0x14ad   :  { %3349 = vrot.lane.b32.xlu1 %v6528_v56, %s6030_s7 }
0x14b1   :  { %3508 = vrot.lane.b32.xlu1 %v6507_v49, %s6031_s3 }
0x14b5   :  { %3586 = vrot.lane.b32.xlu1 %v6514_v52, %s6031_s3 }
0x14b9   :  { %3584 = vrot.lane.b32.xlu1 %v6525_v55, %s6031_s3 }
0x1521   :  { %v3251_v33 = vpop.xlane.xlu0 %3250 }
0x1522   :  { %v3255_v34 = vsub.f32 %v3247_v19, %v3251_v33  ;;  %v2510_v33 = vld [vmem:[#allocation11 + $0x30] sm:$0xff] }
0x1524   :  { %v3257_v36 = vmul.f32 1.442695, %v3255_v34 }
0x1525   :  { %v3254_v41 = vpop.xlane.xlu1 %3253 }
0x1526   :  { %5790 = vpow2.f32 %v3257_v36  ;;  %v3256_v42 = vsub.f32 %v3248_v28, %v3254_v41 }
0x1528   :  { %v3259_v43 = vmul.f32 1.442695, %v3256_v42 }
0x1529   :  { %v3350_v44 = vpop.permute.xlu1 %3349 }
0x152a   :  { %5792 = vpow2.f32 %v3259_v43  ;;  %5600 = vmatpush3.msra.mxu0 %v3350_v44 }
0x152b   :  { %5609 = vmatprep.subr.mxu0 %v6028_v23 }
0x152d   :  { %v3509_v62 = vpop.permute.xlu1 %3508 }
0x1531   :  { %v3587_v2 = vpop.permute.xlu1 %3586 }
0x1533   :  { %v5791_v45 = vpop.eup %5790 }
0x1534   :  { %v3261_v46 = vsel %vm556_vm4, %v5791_v45, 0.0 }
0x1535   :  { %3262 = vadd.xlane.f32.xlu0 %v3261_v46  ;;  %v3585_v5 = vpop.permute.xlu1 %3584 }
0x1537   :  { %v5793_v47 = vpop.eup %5792 }
0x1538   :  { %v3264_v48 = vsel %vm556_vm4, %v5793_v47, 0.0 }
0x1539   :  { %3265 = vadd.xlane.f32.xlu0 %v3264_v48 }
0x154f   :  { %3272 = vrot.lane.b32.xlu0 %v6530_v57, %s6030_s7 }
0x1553   :  { %3506 = vrot.lane.b32.xlu0 %v6511_v51, %s6031_s3 }
0x15be   :  { %v3263_v50 = vpop.xlane.xlu0 %3262 }
0x15bf   :  { %5794 = vrcp.f32 %v3263_v50 }
0x15c2   :  { %v3266_v53 = vpop.xlane.xlu0 %3265 }
0x15c3   :  { %5796 = vrcp.f32 %v3266_v53 }
0x15c6   :  { %v3273_v54 = vpop.permute.xlu0 %3272 }
0x15c7   :  { %5595 = vmatpush3.msra.mxu1 %v3273_v54 }
0x15c8   :  { %5604 = vmatprep.subr.mxu1 %v2509_v0 }
0x15ca   :  { %v3507_v63 = vpop.permute.xlu0 %3506 }
0x15cc   :  { %v5795_v37 = vpop.eup %5794 }
0x15cd   :  { %v3268_v58 = vmul.f32 %v5795_v37, %v5791_v45 }
0x15cf   :  { %5597 = vmatmul.mubr.msk.f32.vlgmr.msra.gmra.mxu1 %vm556_vm4, %v3268_v58 }
0x15d0   :  { %v5797_v38 = vpop.eup %5796  ;;  %5605 = vmatpush3.msra.mxu1 %v2509_v0 }
0x15d1   :  { %v3270_v59 = vmul.f32 %v5797_v38, %v5793_v47  ;;  %5614 = vmatprep.subr.mxu1 %v6028_v23 }
0x15d3   :  { %5602 = vmatmul.mubr.msk.f32.vlgmr.msra.gmra.mxu0 %vm556_vm4, %v3270_v59 }
0x15d4   :  { %5610 = vmatpush3.xpose.msk.msra.mxu0 %vm556_vm4, %v3509_v62  ;;  %5611 = vmatprep.mubr.msk.f32.mxu0 %vm6029_vm3, %v6028_v23 }
0x15d5   :  { %5619 = vmatprep.subr.mxu0 %v6028_v23 }
0x15d7   :  { %5612 = vmatmul.mubr.msk.f32.vlgmr.msra.gmra.mxu0 %vm556_vm4, %v3507_v63 }
0x15d8   :  { %5621 = vmatprep.mubr.msk.f32.mxu0 %vm6029_vm3, %v6028_v23 }
0x168f   :  { %v3344_v1 = vpop.f32.mrf.mxu1 }
0x1690   :  { %5606 = vmatprep.mubr.msk.f32.mxu1 %vm556_vm4, %v3344_v1 }
0x1691   :  { %v5598_v4 = vpop.f32.mrf.mxu1 }
0x1693   :  { %v3421_v3 = vpop.f32.mrf.mxu0 }
0x1694   :  { %5607 = vmatmul.mubr.msk.f32.vlgmr.msra.gmra.mxu1 %vm556_vm4, %v3421_v3 }
0x1695   :  { %5615 = vmatpush3.xpose.msk.msra.mxu1 %vm556_vm4, %v3587_v2  ;;  %v5603_v6 = vpop.f32.mrf.mxu0  ;;  %5616 = vmatprep.mubr.msk.f32.mxu1 %vm6029_vm3, %v6028_v23 }
0x1696   :  { %5624 = vmatprep.subr.mxu1 %v6028_v23 }
0x1697   :  { %v3580_v7 = vpop.f32.mrf.mxu0 }
0x1698   :  { %v3662_v8 = vmul.f32 0.35355338, %v3580_v7  ;;  %5617 = vmatmul.mubr.msk.f32.vlgmr.msra.gmra.mxu1 %vm556_vm4, %v3585_v5 }
0x1699   :  { %v5613_v9 = vpop.f32.mrf.mxu0  ;;  %5626 = vmatprep.mubr.msk.f32.mxu1 %vm6029_vm3, %v6028_v23 }
0x169a   :  { %v3664_v27 = vsel %vm556_vm4, %v3662_v8, -inf }
0x169b   :  { %3665 = vmax.xlane.f32.xlu0 %v3664_v27 }
0x1724   :  { %v3666_v30 = vpop.xlane.xlu0 %3665 }
0x1725   :  { %v3670_v35 = vsub.f32 %v3662_v8, %v3666_v30  ;;  %v2508_v8 = vld [vmem:[#allocation11 + $0x20] sm:$0xff] }
0x1727   :  { %v3672_v10 = vmul.f32 1.442695, %v3670_v35 }
0x1729   :  { %5798 = vpow2.f32 %v3672_v10 }
0x1736   :  { %v5799_v11 = vpop.eup %5798 }
0x1737   :  { %v3676_v12 = vsel %vm556_vm4, %v5799_v11, 0.0 }
0x1738   :  { %3677 = vadd.xlane.f32.xlu0 %v3676_v12 }
0x1754   :  { %v6610_v60 = vpop.f32.mrf.mxu1 }
0x1756   :  { %v6612_v61 = vpop.f32.mrf.mxu1 }
0x1758   :  { %v3658_v13 = vpop.f32.mrf.mxu1 }
0x1759   :  { %v3663_v14 = vmul.f32 0.35355338, %v3658_v13 }
0x175a   :  { %v5618_v32 = vpop.f32.mrf.mxu1 }
0x175b   :  { %v3667_v15 = vsel %vm556_vm4, %v3663_v14, -inf }
0x175c   :  { %3668 = vmax.xlane.f32.xlu1 %v3667_v15 }
0x176d   :  { %3762 = vrot.lane.b32.xlu1 %v6528_v56, %s6031_s3 }
0x1771   :  { %3921 = vrot.lane.b32.xlu1 %v6507_v49, %s6032_s28 }
0x1775   :  { %3999 = vrot.lane.b32.xlu1 %v6514_v52, %s6032_s28 }
0x1779   :  { %3997 = vrot.lane.b32.xlu1 %v6525_v55, %s6032_s28 }
0x17c1   :  { %v3678_v49 = vpop.xlane.xlu0 %3677 }
0x17e5   :  { %v3669_v16 = vpop.xlane.xlu1 %3668 }
0x17e6   :  { %v3671_v20 = vsub.f32 %v3663_v14, %v3669_v16 }
0x17e8   :  { %v3674_v22 = vmul.f32 1.442695, %v3671_v20 }
0x17e9   :  { %v3763_v19 = vpop.permute.xlu1 %3762 }
0x17ea   :  { %5800 = vpow2.f32 %v3674_v22  ;;  %5625 = vmatpush3.msra.mxu1 %v3763_v19 }
0x17eb   :  { %5634 = vmatprep.subr.mxu1 %v6028_v23  ;;  %5802 = vrcp.f32 %v3678_v49 }
0x17ed   :  { %v3922_v31 = vpop.permute.xlu1 %3921 }
0x17f1   :  { %v4000_v41 = vpop.permute.xlu1 %3999 }
0x17f5   :  { %v3998_v44 = vpop.permute.xlu1 %3997 }
0x17f7   :  { %v5801_v24 = vpop.eup %5800 }
0x17f8   :  { %v3679_v18 = vsel %vm556_vm4, %v5801_v24, 0.0  ;;  %v5803_v55 = vpop.eup %5802 }
0x17f9   :  { %3680 = vadd.xlane.f32.xlu0 %v3679_v18  ;;  %v3683_v26 = vmul.f32 %v5803_v55, %v5799_v11 }
0x180f   :  { %3686 = vrot.lane.b32.xlu0 %v6530_v57, %s6031_s3 }
0x1813   :  { %3919 = vrot.lane.b32.xlu0 %v6511_v51, %s6032_s28 }
0x1882   :  { %v3681_v52 = vpop.xlane.xlu0 %3680 }
0x1883   :  { %5804 = vrcp.f32 %v3681_v52 }
0x1886   :  { %v3687_v25 = vpop.permute.xlu0 %3686 }
0x1887   :  { %5620 = vmatpush3.msra.mxu0 %v3687_v25 }
0x1888   :  { %5622 = vmatmul.mubr.msk.f32.vlgmr.msra.gmra.mxu0 %vm556_vm4, %v3683_v26  ;;  %5629 = vmatprep.subr.mxu0 %v2510_v33 }
0x1889   :  { %5630 = vmatpush3.msra.mxu0 %v2510_v33 }
0x188a   :  { %v3920_v51 = vpop.permute.xlu0 %3919  ;;  %5639 = vmatprep.subr.mxu0 %v6028_v23 }
0x1890   :  { %v5805_v28 = vpop.eup %5804 }
0x1891   :  { %v3685_v29 = vmul.f32 %v5805_v28, %v5801_v24 }
0x1893   :  { %5627 = vmatmul.mubr.msk.f32.vlgmr.msra.gmra.mxu1 %vm556_vm4, %v3685_v29 }
0x1894   :  { %5635 = vmatpush3.xpose.msk.msra.mxu1 %vm556_vm4, %v3922_v31  ;;  %5636 = vmatprep.mubr.msk.f32.mxu1 %vm6029_vm3, %v6028_v23 }
0x1895   :  { %5644 = vmatprep.subr.mxu1 %v6028_v23 }
0x1897   :  { %5637 = vmatmul.mubr.msk.f32.vlgmr.msra.gmra.mxu1 %vm556_vm4, %v3920_v51 }
0x1898   :  { %5646 = vmatprep.mubr.msk.f32.mxu1 %vm6029_vm3, %v6028_v23 }
0x1948   :  { %v3758_v34 = vpop.f32.mrf.mxu0 }
0x1949   :  { %5631 = vmatprep.mubr.msk.f32.mxu0 %vm556_vm4, %v3758_v34 }
0x194a   :  { %v5623_v36 = vpop.f32.mrf.mxu0 }
0x1953   :  { %v3834_v42 = vpop.f32.mrf.mxu1 }
0x1954   :  { %5632 = vmatmul.mubr.msk.f32.vlgmr.msra.gmra.mxu0 %vm556_vm4, %v3834_v42 }
0x1955   :  { %5640 = vmatpush3.xpose.msk.msra.mxu0 %vm556_vm4, %v4000_v41  ;;  %v5628_v43 = vpop.f32.mrf.mxu1  ;;  %5641 = vmatprep.mubr.msk.f32.mxu0 %vm6029_vm3, %v6028_v23 }
0x1956   :  { %5649 = vmatprep.subr.mxu0 %v6028_v23 }
0x1957   :  { %v3993_v45 = vpop.f32.mrf.mxu1 }
0x1958   :  { %v4075_v46 = vmul.f32 0.35355338, %v3993_v45  ;;  %5642 = vmatmul.mubr.msk.f32.vlgmr.msra.gmra.mxu0 %vm556_vm4, %v3998_v44  ;;  %v4477_v44 = vld [vmem:[#allocation13 + $0x38] sm:$0xff]  ;;  %v4475_v45 = vld [vmem:[#allocation13 + $0x28] sm:$0xff] }
0x1959   :  { %v5638_v47 = vpop.f32.mrf.mxu1  ;;  %5651 = vmatprep.mubr.msk.f32.mxu0 %vm6029_vm3, %v6028_v23 }
0x195a   :  { %v4077_v48 = vsel %vm556_vm4, %v4075_v46, -inf }
0x195b   :  { %4078 = vmax.xlane.f32.xlu0 %v4077_v48 }
0x19e4   :  { %v4079_v50 = vpop.xlane.xlu0 %4078 }
0x19e5   :  { %v4083_v53 = vsub.f32 %v4075_v46, %v4079_v50  ;;  %v4474_v46 = vld [vmem:[#allocation13 + $0x20] sm:$0xff] }
0x19e7   :  { %v4085_v54 = vmul.f32 1.442695, %v4083_v53 }
0x19e9   :  { %5806 = vpow2.f32 %v4085_v54 }
0x19f6   :  { %v5807_v37 = vpop.eup %5806 }
0x19f7   :  { %v4089_v58 = vsel %vm556_vm4, %v5807_v37, 0.0 }
0x19f8   :  { %4090 = vadd.xlane.f32.xlu0 %v4089_v58 }
0x1a14   :  { %v5633_v38 = vpop.f32.mrf.mxu0 }
0x1a16   :  { %v3910_v59 = vpop.f32.mrf.mxu0 }
0x1a18   :  { %v4071_v62 = vpop.f32.mrf.mxu0 }
0x1a19   :  { %v4076_v63 = vmul.f32 0.35355338, %v4071_v62 }
0x1a1a   :  { %v5643_v0 = vpop.f32.mrf.mxu0 }
0x1a1b   :  { %v4080_v1 = vsel %vm556_vm4, %v4076_v63, -inf }
0x1a1c   :  { %4081 = vmax.xlane.f32.xlu1 %v4080_v1  ;;  %v5182_v1 = vld [vmem:[%s6803_s17 + $0x1] ss:$0 sm:$0xff] }
0x1a2d   :  { %4175 = vrot.lane.b32.xlu1 %v6528_v56, %s6032_s28 }
0x1a81   :  { %v4091_v9 = vpop.xlane.xlu0 %4090 }
0x1aa5   :  { %v4082_v2 = vpop.xlane.xlu1 %4081 }
0x1aa6   :  { %v4084_v4 = vsub.f32 %v4076_v63, %v4082_v2 }
0x1aa8   :  { %v4087_v3 = vmul.f32 1.442695, %v4084_v4 }
0x1aa9   :  { %v4176_v6 = vpop.permute.xlu1 %4175 }
0x1aaa   :  { %5808 = vpow2.f32 %v4087_v3  ;;  %5650 = vmatpush3.msra.mxu0 %v4176_v6  ;;  %v4573_v6 = vld [vmem:[#allocation14 + $0x38] sm:$0xff] }
0x1aab   :  { %5659 = vmatprep.subr.mxu0 %v2508_v8  ;;  %5810 = vrcp.f32 %v4091_v9  ;;  %v5184_v9 = vld [vmem:[%s6799_s13 + $0x1] ss:$0 sm:$0xff] }
0x1ab7   :  { %v5809_v5 = vpop.eup %5808 }
0x1ab8   :  { %v4092_v7 = vsel %vm556_vm4, %v5809_v5, 0.0  ;;  %v5811_v30 = vpop.eup %5810 }
0x1ab9   :  { %4093 = vadd.xlane.f32.xlu0 %v4092_v7  ;;  %v4096_v35 = vmul.f32 %v5811_v30, %v5807_v37  ;;  %v4571_v7 = vld [vmem:[#allocation14 + $0x28] sm:$0xff] }
0x1acf   :  { %4099 = vrot.lane.b32.xlu0 %v6530_v57, %s6032_s28  ;;  %v2511_v57 = vld [vmem:[#allocation11 + $0x38] sm:$0xff] }
0x1b42   :  { %v4094_v27 = vpop.xlane.xlu0 %4093 }
0x1b43   :  { %5812 = vrcp.f32 %v4094_v27 }
0x1b46   :  { %v4100_v56 = vpop.permute.xlu0 %4099 }
0x1b47   :  { %5645 = vmatpush3.msra.mxu1 %v4100_v56 }
0x1b48   :  { %5647 = vmatmul.mubr.msk.f32.vlgmr.msra.gmra.mxu1 %vm556_vm4, %v4096_v35  ;;  %5654 = vmatprep.subr.mxu1 %v2511_v57 }
0x1b49   :  { %5655 = vmatpush3.msra.mxu1 %v2511_v57  ;;  %v5822_v57 = vld [vmem:[%s6836_s8] sm:$0xff] }
0x1b4a   :  { %5664 = vmatprep.subr.mxu1 %v4477_v44 }
0x1b50   :  { %v5813_v10 = vpop.eup %5812 }
0x1b51   :  { %v4098_v11 = vmul.f32 %v5813_v10, %v5809_v5  ;;  %v4572_v5 = vld [vmem:[#allocation14 + $0x30] sm:$0xff] }
0x1b53   :  { %5652 = vmatmul.mubr.msk.f32.vlgmr.msra.gmra.mxu0 %vm556_vm4, %v4098_v11 }
0x1b54   :  { %5661 = vmatprep.mubr.msk.f32.mxu0 %vm556_vm4, %v6568_v17  ;;  %5660 = vmatpush3.msra.mxu0 %v2508_v8  ;;  %v4570_v8 = vld [vmem:[#allocation14 + $0x20] sm:$0xff] }
0x1b55   :  { %5675 = vmatprep.subr.mxu0 %v4573_v6 }
0x1b57   :  { %5662 = vmatmul.mubr.msk.f32.vlgmr.msra.gmra.mxu0 %vm556_vm4, %v6570_v21  ;;  %v5178_v21 = vld [vmem:[%s6797_s11 + $0x1] ss:$0 sm:$0xff] }
0x1b58   :  { %5676 = vmatpush3.msra.mxu0 %v4573_v6 }
0x1b59   :  { %5677 = vmatprep.subr.mxu0 %v4572_v5 }
0x1b5a   :  { %5678 = vmatpush3.msra.mxu0 %v4572_v5 }
0x1b5b   :  { %5679 = vmatprep.subr.mxu0 %v4571_v7 }
0x1b5c   :  { %5680 = vmatpush3.msra.mxu0 %v4571_v7 }
0x1b5d   :  { %5681 = vmatprep.subr.mxu0 %v4570_v8 }
0x1b5e   :  { %5682 = vmatpush3.msra.mxu0 %v4570_v8 }
0x1b5f   :  { %5691 = vmatprep.subr.mxu0 %v6028_v23 }
0x1c08   :  { %v4171_v12 = vpop.f32.mrf.mxu1 }
0x1c09   :  { %5656 = vmatprep.mubr.msk.f32.mxu1 %vm556_vm4, %v4171_v12  ;;  %v4719_v12 = vrot.slane %v5822_v57, 7  ;;  %v5200_v57 = vld [vmem:[%s6809_s23] ss:$0 sm:$0xff] }
0x1c0a   :  { %v5648_v13 = vpop.f32.mrf.mxu1 }
0x1c0b   :  { %v5823_v13 = vld [vmem:[%s6836_s8 + $0x8] sm:$0xff] }
0x1c13   :  { %v4247_v14 = vpop.f32.mrf.mxu0 }
0x1c14   :  { %5657 = vmatmul.mubr.msk.f32.vlgmr.msra.gmra.mxu1 %vm556_vm4, %v4247_v14  ;;  %v4720_v14 = vrot.slane %v5823_v13, 6 }
0x1c15   :  { %v5653_v32 = vpop.f32.mrf.mxu0  ;;  %5665 = vmatpush3.msra.mxu1 %v4477_v44  ;;  %v4799_v44 = vld [vmem:[%s6808_s22 + $0x8] sm:$0xff] }
0x1c16   :  { %v4711_v32 = vld [vmem:[%s6806_s20] sm:$0xf] }
0x1c17   :  { %v5663_v15 = vpop.f32.mrf.mxu0 }
0x1c18   :  { %v4410_v20 = vadd.f32 %v5663_v15, %v6610_v60  ;;  %v4722_v15 = vsel %vm4721_vm5, %v4720_v14, %v4719_v12 }
0x1c19   :  { %v4404_v16 = vpop.f32.mrf.mxu0 }
0x1c1a   :  { %v4405_v17 = vadd.f32 %v4404_v16, %v6612_v61  ;;  %v4414_v22 = vadd.f32 %v5633_v38, %v4410_v20  ;;  %v5181_v38 = vld [vmem:[%s6802_s16 + $0x1] ss:$0 sm:$0xff] }
0x1c1b   :  { %v5188_v16 = vld [vmem:[%s6801_s15 + $0x1] ss:$0 sm:$0xff] }
0x1c1c   :  { %v4413_v18 = vadd.f32 %v4405_v17, %v3910_v59 }
0x1cd4   :  { %v5658_v19 = vpop.f32.mrf.mxu1 }
0x1cd5   :  { %v4416_v24 = vadd.f32 %v5658_v19, %v4414_v22 }
0x1cd6   :  { %v4323_v49 = vpop.f32.mrf.mxu1 }
0x1cd7   :  { %v4424_v52 = vadd.f32 %v5178_v21, %v4416_v24  ;;  %v4415_v55 = vadd.f32 %v4413_v18, %v4323_v49 }
0x1cd9   :  { %v4423_v25 = vadd.f32 %v5178_v21, %v4415_v55  ;;  %v4426_v26 = vadd.f32 %v4424_v52, %v6485_v40 }
0x1cdb   :  { %v4434_v28 = vsel %vm312_vm2, %v4426_v26, 0.0  ;;  %v4425_v60 = vadd.f32 %v4423_v25, %v6483_v39  ;;  %v4476_v39 = vld [vmem:[#allocation13 + $0x30] sm:$0xff] }
0x1cdc   :  { %4435 = vadd.xlane.f32.xlu0 %v4434_v28  ;;  %5666 = vmatprep.subr.mxu1 %v4476_v39 }
0x1cdd   :  { %v4431_v61 = vsel %vm312_vm2, %v4425_v60, 0.0  ;;  %5667 = vmatpush3.msra.mxu1 %v4476_v39 }
0x1cde   :  { %4432 = vadd.xlane.f32.xlu1 %v4431_v61  ;;  %5668 = vmatprep.subr.mxu1 %v4475_v45 }
0x1cdf   :  { %5669 = vmatpush3.msra.mxu1 %v4475_v45 }
0x1ce0   :  { %5670 = vmatprep.subr.mxu1 %v4474_v46 }
0x1ce1   :  { %5671 = vmatpush3.msra.mxu1 %v4474_v46  ;;  %v4802_v46 = vld [vmem:[%s6808_s22 + $0x20] sm:$0xff] }
0x1ce2   :  { %5686 = vmatprep.subr.mxu1 %v6028_v23 }
0x1d65   :  { %v4436_v29 = vpop.xlane.xlu0 %4435 }
0x1d66   :  { %v4438_v31 = vmul.f32 0.03125, %v4436_v29 }
0x1d67   :  { %v4433_v51 = vpop.xlane.xlu1 %4432 }
0x1d68   :  { %v4440_v33 = vsub.f32 %v4426_v26, %v4438_v31  ;;  %v4437_v34 = vmul.f32 0.03125, %v4433_v51 }
0x1d6a   :  { %v4439_v36 = vsub.f32 %v4425_v60, %v4437_v34  ;;  %v4442_v41 = vmul.f32 %v4440_v33, %v4440_v33  ;;  %v4801_v34 = vld [vmem:[%s6808_s22 + $0x18] sm:$0xff] }
0x1d6c   :  { %v4446_v42 = vsel %vm312_vm2, %v4442_v41, 0.0  ;;  %v4441_v43 = vmul.f32 %v4439_v36, %v4439_v36 }
0x1d6d   :  { %4447 = vadd.xlane.f32.xlu1 %v4446_v42  ;;  %v4800_v42 = vld [vmem:[%s6808_s22 + $0x10] sm:$0xff] }
0x1d6e   :  { %v4443_v40 = vsel %vm312_vm2, %v4441_v43, 0.0  ;;  %v5195_v43 = vld [vmem:[%s6807_s21] ss:$0 sm:$0xff] }
0x1d6f   :  { %4444 = vadd.xlane.f32.xlu0 %v4443_v40  ;;  %v4803_v40 = vld [vmem:[%s6808_s22 + $0x28] sm:$0xff] }
0x1df6   :  { %v4448_v47 = vpop.xlane.xlu1 %4447 }
0x1df7   :  { %v4450_v48 = vmul.f32 0.03125, %v4448_v47  ;;  %v4798_v47 = vld [vmem:[%s6808_s22] sm:$0xff] }
0x1df8   :  { %v4445_v50 = vpop.xlane.xlu0 %4444 }
0x1df9   :  { %v4452_v53 = vadd.f32 1e-05, %v4450_v48  ;;  %v4449_v54 = vmul.f32 0.03125, %v4445_v50 }
0x1dfb   :  { %5814 = vrsqrt.f32 %v4452_v53  ;;  %v4451_v37 = vadd.f32 1e-05, %v4449_v54 }
0x1dfd   :  { %5816 = vrsqrt.f32 %v4451_v37 }
0x1e08   :  { %v5815_v58 = vpop.eup %5814 }
0x1e09   :  { %v4456_v59 = vmul.f32 %v5815_v58, %v4440_v33  ;;  %v4805_v33 = vld [vmem:[%s6808_s22 + $0x38] sm:$0xff] }
0x1e0a   :  { %v5817_v62 = vpop.eup %5816 }
0x1e0b   :  { %v4455_v63 = vmul.f32 %v5817_v62, %v4439_v36  ;;  %v4464_v0 = vmul.f32 %v5181_v38, %v4456_v59  ;;  %v4804_v36 = vld [vmem:[%s6808_s22 + $0x30] sm:$0xff]  ;;  %v5193_v59 = vld [vmem:[%s6804_s18 + $0x1] ss:$0 sm:$0xff] }
0x1e0d   :  { %v4463_v2 = vmul.f32 %v5181_v38, %v4455_v63  ;;  %v4472_v3 = vadd.f32 %v5182_v1, %v4464_v0  ;;  %v5194_v0 = vld [vmem:[%s6805_s19 + $0x1] ss:$0 sm:$0xff] }
0x1e0f   :  { %v4471_v4 = vadd.f32 %v5182_v1, %v4463_v2 }
0x1e11   :  { %5672 = vmatprep.mubr.msk.f32.mxu1 %vm312_vm2, %v4471_v4 }
0x1e12   :  { %5673 = vmatmul.mubr.msk.f32.vlgmr.msra.gmra.mxu1 %vm312_vm2, %v4472_v3 }
0x1e13   :  { %5688 = vmatprep.mubr.msk.f32.mxu1 %vm6029_vm3, %v6028_v23  ;;  %5687 = vmatpush3.msk.msra.mxu1 %vm205_vm0, %v4711_v32 }
0x1e14   :  { %5702 = vmatprep.subr.mxu1 %v6028_v23 }
0x1e16   :  { %5689 = vmatmul.mubr.msk.f32.vlgmr.msra.gmra.mxu1 %vm198_vm1, %v4722_v15  ;;  %v5201_v15 = vld [vmem:[%s6811_s25] ss:$0 sm:$0xff] }
0x1e17   :  { %5710 = vmatprep.mubr.msk.f32.mxu1 %vm6029_vm3, %v6028_v23  ;;  %5703 = vmatpush3.msra.mxu1 %v4801_v34 }
0x1e18   :  { %5704 = vmatprep.subr.mxu1 %v6028_v23 }
0x1e19   :  { %5705 = vmatpush3.msra.mxu1 %v4800_v42 }
0x1e1a   :  { %5706 = vmatprep.subr.mxu1 %v6028_v23 }
0x1e1b   :  { %5707 = vmatpush3.msra.mxu1 %v4799_v44 }
0x1e1c   :  { %5708 = vmatprep.subr.mxu1 %v6028_v23 }
0x1e1d   :  { %5709 = vmatpush3.msra.mxu1 %v4798_v47 }
0x1ed2   :  { %v5674_v27 = vpop.f32.mrf.mxu1 }
0x1ed3   :  { %v4564_v30 = vadd.f32 %v5674_v27, %v5184_v9 }
0x1ed4   :  { %v4558_v56 = vpop.f32.mrf.mxu1 }
0x1ed5   :  { %v4559_v35 = vadd.f32 %v5184_v9, %v4558_v56  ;;  %v4568_v11 = vmax.f32 %v4564_v30, 0.0  ;;  %v4968_v30 = vld [vmem:[%s6810_s24 + $0x18] sm:$0xff]  ;;  %v4967_v56 = vld [vmem:[%s6810_s24 + $0x10] sm:$0xff] }
0x1ed6   :  { %v4794_v41 = vpop.f32.mrf.mxu1 }
0x1ed7   :  { %v4567_v10 = vmax.f32 %v4559_v35, 0.0  ;;  %v4795_v45 = vadd.f32 %v5195_v43, %v4794_v41  ;;  %v4966_v35 = vld [vmem:[%s6810_s24 + $0x8] sm:$0xff] }
0x1ed8   :  { %v5690_v39 = vpop.f32.mrf.mxu1 }
0x1ed9   :  { %5683 = vmatprep.mubr.msk.f32.mxu0 %vm312_vm2, %v4567_v10  ;;  %v4965_v10 = vld [vmem:[%s6810_s24] sm:$0xff]  ;;  %s5057_s24 = sshll.u32 %s6033_s9, 4  ;;  %s5058_s24 = int_to_ptr.vmem [resolvable:$true] %s5057_s24 }
0x1eda   :  { %5684 = vmatmul.mubr.msk.f32.vlgmr.msra.gmra.mxu0 %vm312_vm2, %v4568_v11  ;;  %s5984_s12 = scalar_lea.vmem %s5058_s24, 32  ;;  %p5989_p13 = scmp.lt.s32.totalorder %s5058_s24, %s5058_s24 }
0x1edb   :  { %5699 = vmatprep.mubr.msk.f32.mxu0 %vm6029_vm3, %v6028_v23  ;;  %5692 = vmatpush3.msra.mxu0 %v4805_v33  ;;  %p5985_p12 = scmp.ne.s32.totalorder %s5058_s24, %s5984_s12  ;;  %p5990_p0 = scmp.lt.s32.totalorder %s5984_s12, %s5984_s12 }
0x1edc   :  { %5693 = vmatprep.subr.mxu0 %v6028_v23 }
0x1edd   :  { %5694 = vmatpush3.msra.mxu0 %v4804_v36  ;;  %p5991_p1 = por %p5990_p0, %p5989_p13 }
0x1ede   :  { %5695 = vmatprep.subr.mxu0 %v6028_v23 }
0x1edf   :  { %5696 = vmatpush3.msra.mxu0 %v4803_v40  ;;  %p5992_p2 = pnand %p5991_p1, %p5985_p12 }
0x1ee0   :  { %5697 = vmatprep.subr.mxu0 %v6028_v23 }
0x1ee1   :  { %5698 = vmatpush3.msra.mxu0 %v4802_v46 }
0x1ee2   :  { %5700 = vmatmul.mubr.msk.f32.vlgmr.msra.gmra.mxu0 %vm312_vm2, %v4795_v45  ;;  %5713 = vmatprep.subr.mxu0 %v6028_v23 }
0x1ee3   :  { %5721 = vmatprep.mubr.msk.f32.mxu0 %vm6029_vm3, %v6028_v23  ;;  %5714 = vmatpush3.msra.mxu0 %v4968_v30 }
0x1ee4   :  { %5715 = vmatprep.subr.mxu0 %v6028_v23 }
0x1ee5   :  { %5716 = vmatpush3.msra.mxu0 %v4967_v56 }
0x1ee6   :  { %5717 = vmatprep.subr.mxu0 %v6028_v23 }
0x1ee7   :  { %5718 = vmatpush3.msra.mxu0 %v4966_v35 }
0x1ee8   :  { %5719 = vmatprep.subr.mxu0 %v6028_v23 }
0x1ee9   :  { %5720 = vmatpush3.msra.mxu0 %v4965_v10 }
0x1f9a   :  { %v5685_v20 = vpop.f32.mrf.mxu0 }
0x1f9b   :  { %v4660_v17 = vadd.f32 %v5685_v20, %v5188_v16 }
0x1f9c   :  { %v4654_v22 = vpop.f32.mrf.mxu0 }
0x1f9d   :  { %v4655_v21 = vadd.f32 %v5188_v16, %v4654_v22  ;;  %v4664_v19 = vadd.f32 %v4660_v17, %v4472_v3 }
0x1f9f   :  { %v4672_v24 = vsel %vm312_vm2, %v4664_v19, 0.0  ;;  %v4663_v18 = vadd.f32 %v4655_v21, %v4471_v4 }
0x1fa0   :  { %4673 = vadd.xlane.f32.xlu1 %v4672_v24 }
0x1fa1   :  { %v4669_v49 = vsel %vm312_vm2, %v4663_v18, 0.0 }
0x1fa2   :  { %4670 = vadd.xlane.f32.xlu0 %v4669_v49  ;;  %v4875_v9 = vpop.f32.mrf.mxu0 }
0x1fa4   :  { %v5701_v27 = vpop.f32.mrf.mxu0 }
0x2029   :  { %v4674_v52 = vpop.xlane.xlu1 %4673 }
0x202a   :  { %v4676_v55 = vmul.f32 0.03125, %v4674_v52 }
0x202b   :  { %v4671_v25 = vpop.xlane.xlu0 %4670 }
0x202c   :  { %v4678_v26 = vsub.f32 %v4664_v19, %v4676_v55  ;;  %v4675_v28 = vmul.f32 0.03125, %v4671_v25 }
0x202e   :  { %v4677_v60 = vsub.f32 %v4663_v18, %v4675_v28  ;;  %v4680_v61 = vmul.f32 %v4678_v26, %v4678_v26 }
0x2030   :  { %v4684_v29 = vsel %vm312_vm2, %v4680_v61, 0.0  ;;  %v4679_v31 = vmul.f32 %v4677_v60, %v4677_v60 }
0x2031   :  { %4685 = vadd.xlane.f32.xlu1 %v4684_v29 }
0x2032   :  { %v4681_v51 = vsel %vm312_vm2, %v4679_v31, 0.0 }
0x2033   :  { %4682 = vadd.xlane.f32.xlu0 %v4681_v51 }
0x20ba   :  { %v4686_v48 = vpop.xlane.xlu1 %4685 }
0x20bb   :  { %v4688_v50 = vmul.f32 0.03125, %v4686_v48 }
0x20bc   :  { %v4683_v53 = vpop.xlane.xlu0 %4682 }
0x20bd   :  { %v4690_v54 = vadd.f32 1e-05, %v4688_v50  ;;  %v4687_v37 = vmul.f32 0.03125, %v4683_v53 }
0x20bf   :  { %5818 = vrsqrt.f32 %v4690_v54  ;;  %v4689_v58 = vadd.f32 1e-05, %v4687_v37 }
0x20c1   :  { %5820 = vrsqrt.f32 %v4689_v58 }
0x20cc   :  { %v5819_v38 = vpop.eup %5818 }
0x20cd   :  { %v4694_v62 = vmul.f32 %v5819_v38, %v4678_v26 }
0x20ce   :  { %v5821_v63 = vpop.eup %5820 }
0x20cf   :  { %v4693_v1 = vmul.f32 %v5821_v63, %v4677_v60  ;;  %v4702_v2 = vmul.f32 %v5193_v59, %v4694_v62 }
0x20d1   :  { %v4701_v4 = vmul.f32 %v5193_v59, %v4693_v1  ;;  %v4710_v3 = vadd.f32 %v5194_v0, %v4702_v2 }
0x20d3   :  { %v4709_v6 = vadd.f32 %v5194_v0, %v4701_v4  ;;  %v4882_v7 = vrot.slane %v4710_v3, 6 }
0x20d5   :  { %v4881_v5 = vrot.slane %v4709_v6, 7 }
0x20d7   :  { %v4883_v8 = vsel %vm4721_vm5, %v4882_v7, %v4881_v5 }
0x20d8   :  { %5711 = vmatmul.mubr.msk.f32.vlgmr.msra.gmra.mxu1 %vm312_vm2, %v4883_v8 }
0x2198   :  { %v4952_v11 = vpop.f32.mrf.mxu1 }
0x2199   :  { %v4953_v12 = vadd.f32 %v4952_v11, %v4875_v9 }
0x219a   :  { %v5712_v13 = vpop.f32.mrf.mxu1 }
0x219b   :  { %v4963_v14 = vadd.f32 %v5200_v57, %v4953_v12 }
0x219d   :  { %v4964_v32 = vmax.f32 %v4963_v14, 0.0 }
0x219f   :  { %5722 = vmatmul.mubr.msk.f32.vlgmr.msra.gmra.mxu0 %vm312_vm2, %v4964_v32 }
0x225f   :  { %v5045_v16 = vpop.f32.mrf.mxu0 }
0x2260   :  { %v5046_v23 = vadd.f32 %v5201_v15, %v5045_v16 }
0x2261   :  { %v5723_v20 = vpop.f32.mrf.mxu0 }
0x2262   :  { %5050 = vst.msk [vmem:[#allocation16] sm:$0x3] %vm5049_vm6, %v5046_v23 }
0x2263   :  { %5995 = shalt.err (!%p5992_p2)
}
0x2264   :  { %s6841_s7 = sld [smem:[#allocation34_spill]] }
0x226a   :  { %5060 = dma.vmem_to_hbm [thread:$0]  %s5058_s24, 32, %s6841_s7, [#allocation4]  }
0x226b   :  { %6014 = dma.done.wait [#allocation4], 32  }
0x226c   :  { %6015 = vsyncadd [#allocation4], 4294967264 }
0x226d   :  { %5064 = vsyncpa [#allocation3], 1 }
0x226e   :  { %5065 = vsyncpa [#allocation6], 1 }
0x226f   :  { %5066 = vsyncpa [#allocation9], 1 }
0x2270   :  { %5067 = vsyncpa [#allocation12], 1 }
0x2271   :  { %5068 = vsyncpa [#allocation15], 1 }
0x2272   :  { %5069 = vsyncpa [#allocation4], 1 }

</bundles_post_ra>
